<compile_context>
chip_gen: v6e
topology: v6e:2x2x1
jax: 0.10.0
libtpu: 0.0.40
codegen_flags: <defaults>
</compile_context>

<pallas_src>
import jax
import jax.numpy as jnp
from jax.experimental import pallas as pl
from jax.experimental.pallas import tpu as pltpu


def _make_kernel(Bt, N, D):
    """Build the fused kernel as a closure over the static tile sizes."""
    M = Bt * N

    def kernel(x_ref, a_ref, v_ref,
               wg1_ref, bg1_ref, wg2_ref, bg2_ref,
               wm1_ref, bm1_ref, wm2_ref, bm2_ref,
               wf1_ref, bf1_ref, wf2_ref, bf2_ref,
               out_ref):
        cd = x_ref.dtype
        x = x_ref[0]                                   # (M, Fp)  flattened node rows
        a = a_ref[0]                                   # (M, M)   block-diagonal A_hat

        # ---- GCNConvNet layer 1: A_hat @ (X @ W1) + b1, ReLU ----
        h = jnp.dot(x, wg1_ref[...], preferred_element_type=jnp.float32)          # (M, D)
        h = jnp.dot(a, h.astype(cd), preferred_element_type=jnp.float32)          # (M, D)
        h = jnp.maximum(h + bg1_ref[...], 0.0)

        # ---- GCNConvNet layer 2: A_hat @ (H @ W2) + b2 ----
        h = jnp.dot(h.astype(cd), wg2_ref[...], preferred_element_type=jnp.float32)
        p_emb = jnp.dot(a, h.astype(cd), preferred_element_type=jnp.float32) + bg2_ref[...]  # (M, D)

        # ---- MLPNet on v_net_x: Linear -> ReLU -> Linear (all Bt rows at once) ----
        ve = jnp.dot(v_ref[0], wm1_ref[...], preferred_element_type=jnp.float32) + bm1_ref[...]
        ve = jnp.maximum(ve, 0.0)
        v_emb = jnp.dot(ve.astype(cd), wm2_ref[...],
                        preferred_element_type=jnp.float32) + bm2_ref[...]         # (Bt, D)

        # ---- fusion: p_emb + broadcast(v_emb); Linear(D,D) -> ReLU -> Linear(D,1) ----
        fused = p_emb.reshape(Bt, N, D) + v_emb[:, None, :]                        # (Bt, N, D)
        z = jnp.dot(fused.reshape(M, D).astype(cd), wf1_ref[...],
                    preferred_element_type=jnp.float32) + bf1_ref[...]             # (M, D)
        z = jnp.maximum(z, 0.0)

        # Final Linear(D,1) as VPU multiply + lane reduction -> lane-dense (1,1,M) tile.
        logits = jnp.sum(z * wf2_ref[...].astype(jnp.float32), axis=-1) + bf2_ref[0, 0]  # (M,)
        out_ref[...] = logits[None, None, :].astype(out_ref.dtype)

    return kernel


def _pick_batch_tile(B, N):
    """Largest divisor Bt of B with Bt*N <= 512, preferring >= 2 grid steps
    (v7x has 2 TensorCores) as long as the MXU row fill stays >= 128."""
    divisors = [d for d in range(1, B + 1) if B % d == 0]
    cands = [d for d in divisors if d * N <= 512] or [1]
    pref = [d for d in cands if (B // d) >= 2 and d * N >= 128]
    return max(pref) if pref else max(cands)


def gcn_actor_forward(x, a_hat, v_x, params, *, batch_tile=None,
                      compute_dtype=jnp.float32):
    """Fused GcnActor forward.  batch_tile = batch elements per grid step
    (auto-chosen so Bt*N fills the MXU row dim and the grid has >=2 steps when
    possible).  compute_dtype=bfloat16 is recommended on v6e/v7x."""
    B, N, Fp = x.shape
    Fv = v_x.shape[1]
    D = params["wg1"].shape[1]

    Bt = _pick_batch_tile(B, N) if batch_tile is None else batch_tile
    assert B % Bt == 0, "batch_tile must divide the batch size"
    G = B // Bt
    M = Bt * N

    cd = compute_dtype
    # weights in compute dtype (MXU operands); biases stay f32 (added to f32 accumulators)
    w = {k: (v.astype(cd) if k.startswith("w") else v.astype(jnp.float32))
         for k, v in params.items()}
    wf2_row = w["wf2"].reshape(1, D)                       # (D,1) -> (1,D) row for mul+reduce
    bf2_scalar = params["bf2"].reshape(1, 1).astype(jnp.float32)

    # Flatten the batch tile into the row dimension, and build the block-diagonal
    # adjacency so each GCN layer is one (M,M)@(M,D) MXU matmul (glue, plain JAX).
    x_t = x.astype(cd).reshape(G, M, Fp)
    v_t = v_x.astype(cd).reshape(G, Bt, Fv)
    a_g = a_hat.astype(cd).reshape(G, Bt, N, N)
    eye_bt = jnp.eye(Bt, dtype=cd)
    a_bd = (a_g[:, :, :, None, :] * eye_bt[None, :, None, :, None]).reshape(G, M, M)

    # Generation-aware VMEM budget (v5e/v6e: 128 MiB physical; v7x: 64 MiB).
    try:
        info = pltpu.get_tpu_info()
        vmem_cap = int(getattr(info, "vmem_capacity_bytes", 64 << 20))
    except Exception:
        vmem_cap = 64 << 20
    vmem_limit = int(min(vmem_cap * 3 // 4, 96 << 20))

    def weight_spec(shape):
        return pl.BlockSpec(shape, lambda g, _r=len(shape): (0,) * _r)

    in_specs = [
        pl.BlockSpec((1, M, Fp), lambda g: (g, 0, 0)),     # X (flattened rows)
        pl.BlockSpec((1, M, M), lambda g: (g, 0, 0)),      # block-diagonal A_hat
        pl.BlockSpec((1, Bt, Fv), lambda g: (g, 0, 0)),    # v_net_x
        weight_spec((Fp, D)), weight_spec((1, D)),         # GCN layer 1
        weight_spec((D, D)),  weight_spec((1, D)),         # GCN layer 2
        weight_spec((Fv, D)), weight_spec((1, D)),         # MLP layer 1
        weight_spec((D, D)),  weight_spec((1, D)),         # MLP layer 2
        weight_spec((D, D)),  weight_spec((1, D)),         # fusion Linear(D, D)
        weight_spec((1, D)),                               # fusion Linear(D, 1) as row
        pl.BlockSpec(memory_space=pltpu.MemorySpace.SMEM), # its scalar bias
    ]

    out = pl.pallas_call(
        _make_kernel(Bt, N, D),
        out_shape=jax.ShapeDtypeStruct((G, 1, M), jnp.float32),
        grid_spec=pltpu.PrefetchScalarGridSpec(
            num_scalar_prefetch=0,
            grid=(G,),
            in_specs=in_specs,
            out_specs=pl.BlockSpec((1, 1, M), lambda g: (g, 0, 0)),
        ),
        compiler_params=pltpu.CompilerParams(
            dimension_semantics=("parallel",),
            vmem_limit_bytes=vmem_limit,
        ),
    )(x_t, a_bd, v_t,
      w["wg1"], w["bg1"], w["wg2"], w["bg2"],
      w["wm1"], w["bm1"], w["wm2"], w["bm2"],
      w["wf1"], w["bf1"], wf2_row, bf2_scalar)

    return out.reshape(B, N)   # lane-dense store inside the kernel; cheap reshape here


def gcn_actor_reference(x, a_hat, v_x, params):
    """Pure-JAX reference for correctness check."""
    h = jnp.einsum('bnf,fd->bnd', x, params["wg1"])
    h = jnp.einsum('bij,bjd->bid', a_hat, h) + params["bg1"]
    h = jnp.maximum(h, 0.0)
    h = jnp.einsum('bnd,de->bne', h, params["wg2"])
    p_emb = jnp.einsum('bij,bjd->bid', a_hat, h) + params["bg2"]
    ve = jnp.maximum(v_x @ params["wm1"] + params["bm1"], 0.0)
    v_emb = ve @ params["wm2"] + params["bm2"]
    fused = p_emb + v_emb[:, None, :]
    z = jnp.maximum(jnp.einsum('bnd,de->bne', fused, params["wf1"]) + params["bf1"], 0.0)
    return jnp.einsum('bnd,de->bne', z, params["wf2"])[..., 0] + params["bf2"][0, 0]


def init_params(key, p_net_x_dim, v_node_feature_dim, embedding_dim):
    """Deterministic synthetic parameters (shapes match the module's __init__)."""
    ks = jax.random.split(key, 12)

    def lin(kw, kb, fin, fout):
        scale = 1.0 / jnp.sqrt(jnp.float32(fin))
        wgt = jax.random.normal(kw, (fin, fout), jnp.float32) * scale
        b = jax.random.normal(kb, (1, fout), jnp.float32) * scale
        return wgt, b

    D = embedding_dim
    wg1, bg1 = lin(ks[0], ks[1], p_net_x_dim, D)
    wg2, bg2 = lin(ks[2], ks[3], D, D)
    wm1, bm1 = lin(ks[4], ks[5], v_node_feature_dim, D)
    wm2, bm2 = lin(ks[6], ks[7], D, D)
    wf1, bf1 = lin(ks[8], ks[9], D, D)
    wf2, bf2 = lin(ks[10], ks[11], D, 1)
    return dict(wg1=wg1, bg1=bg1, wg2=wg2, bg2=bg2,
                wm1=wm1, bm1=bm1, wm2=wm2, bm2=bm2,
                wf1=wf1, bf1=bf1, wf2=wf2, bf2=bf2)


def make_normalized_adj(key, B, N):
    """A_hat = D^-1/2 (A + I) D^-1/2 for a random symmetric graph (glue, plain JAX)."""
    a = jax.random.bernoulli(key, 0.3, (B, N, N)).astype(jnp.float32)
    a = jnp.maximum(a, jnp.transpose(a, (0, 2, 1)))                     # symmetrize
    a = jnp.minimum(a + jnp.eye(N, dtype=jnp.float32)[None], 1.0)       # add self loops
    deg = a.sum(axis=-1)
    d_inv_sqrt = 1.0 / jnp.sqrt(deg)
    return a * d_inv_sqrt[:, :, None] * d_inv_sqrt[:, None, :]


if __name__ == "__main__":
    # small shapes consistent with the module (embedding_dim default = 128):
    B = 16      # batch (auto-tile -> Bt=8, grid=2, M=Bt*N=128 lane-dense rows)
    N = 16      # p_net_num_nodes
    Fp = 8      # p_net_x_dim
    Fv = 8      # v_node_feature_dim
    D = 128     # embedding_dim (module default; lane-width-full)

    key = jax.random.PRNGKey(0)
    k_x, k_v, k_a, k_p = jax.random.split(key, 4)

    x = jax.random.normal(k_x, (B, N, Fp), jnp.float32)      # obs['p_net'] node features
    v_x = jax.random.normal(k_v, (B, Fv), jnp.float32)       # obs['v_net_x']
    a_hat = make_normalized_adj(k_a, B, N)                   # obs['p_net'] graph structure
    params = init_params(k_p, Fp, Fv, D)

    logits = gcn_actor_forward(x, a_hat, v_x, params)        # f32; use bf16 on v6e/v7x
    jax.block_until_ready(logits)

    ref = gcn_actor_reference(x, a_hat, v_x, params)
    assert logits.shape == (B, N)
    assert bool(jnp.all(jnp.isfinite(logits)))
    assert bool(jnp.allclose(logits, ref, rtol=2e-3, atol=2e-3)), \
        f"mismatch: max abs err {float(jnp.max(jnp.abs(logits - ref)))}"
    print("KERNEL_OK")
</pallas_src>

<mosaic_0001>
module attributes {stable_mosaic.version = 11 : i64} {
  func.func @kernel(%arg0: i32, %arg1: memref<1x128x8xf32, #tpu.memory_space<vmem>>, %arg2: memref<1x128x128xf32, #tpu.memory_space<vmem>>, %arg3: memref<1x8x8xf32, #tpu.memory_space<vmem>>, %arg4: memref<8x128xf32, #tpu.memory_space<vmem>>, %arg5: memref<1x128xf32, #tpu.memory_space<vmem>>, %arg6: memref<128x128xf32, #tpu.memory_space<vmem>>, %arg7: memref<1x128xf32, #tpu.memory_space<vmem>>, %arg8: memref<8x128xf32, #tpu.memory_space<vmem>>, %arg9: memref<1x128xf32, #tpu.memory_space<vmem>>, %arg10: memref<128x128xf32, #tpu.memory_space<vmem>>, %arg11: memref<1x128xf32, #tpu.memory_space<vmem>>, %arg12: memref<128x128xf32, #tpu.memory_space<vmem>>, %arg13: memref<1x128xf32, #tpu.memory_space<vmem>>, %arg14: memref<1x128xf32, #tpu.memory_space<vmem>>, %arg15: memref<1x1xf32, #tpu.memory_space<smem>>, %arg16: memref<1x1x128xf32, #tpu.memory_space<vmem>>) attributes {dimension_semantics = [#tpu.dimension_semantics<parallel>], iteration_bounds = array<i64: 2>, scalar_prefetch = 0 : i64, scratch_operands = 0 : i64, tpu.core_type = #tpu.core_type<tc>, window_params = [{transform_indices = @transform_0, window_bounds = array<i64: 1, 128, 8>}, {transform_indices = @transform_1, window_bounds = array<i64: 1, 128, 128>}, {transform_indices = @transform_2, window_bounds = array<i64: 1, 8, 8>}, {pipeline_mode = #tpu.pipeline_mode<synchronous>, transform_indices = @transform_3, window_bounds = array<i64: 8, 128>}, {pipeline_mode = #tpu.pipeline_mode<synchronous>, transform_indices = @transform_4, window_bounds = array<i64: 1, 128>}, {pipeline_mode = #tpu.pipeline_mode<synchronous>, transform_indices = @transform_5, window_bounds = array<i64: 128, 128>}, {pipeline_mode = #tpu.pipeline_mode<synchronous>, transform_indices = @transform_6, window_bounds = array<i64: 1, 128>}, {pipeline_mode = #tpu.pipeline_mode<synchronous>, transform_indices = @transform_7, window_bounds = array<i64: 8, 128>}, {pipeline_mode = #tpu.pipeline_mode<synchronous>, transform_indices = @transform_8, window_bounds = array<i64: 1, 128>}, {pipeline_mode = #tpu.pipeline_mode<synchronous>, transform_indices = @transform_9, window_bounds = array<i64: 128, 128>}, {pipeline_mode = #tpu.pipeline_mode<synchronous>, transform_indices = @transform_10, window_bounds = array<i64: 1, 128>}, {pipeline_mode = #tpu.pipeline_mode<synchronous>, transform_indices = @transform_11, window_bounds = array<i64: 128, 128>}, {pipeline_mode = #tpu.pipeline_mode<synchronous>, transform_indices = @transform_12, window_bounds = array<i64: 1, 128>}, {pipeline_mode = #tpu.pipeline_mode<synchronous>, transform_indices = @transform_13, window_bounds = array<i64: 1, 128>}, {transform_indices = @transform_14, window_bounds = array<i64: 1, 1>}, {transform_indices = @transform_15, window_bounds = array<i64: 1, 1, 128>}]} {
    %c0 = arith.constant 0 : index
    %c0_0 = arith.constant 0 : index
    %c0_1 = arith.constant 0 : index
    %0 = vector.load %arg1[%c0, %c0_0, %c0_1] : memref<1x128x8xf32, #tpu.memory_space<vmem>>, vector<1x128x8xf32>
    %1 = vector.shape_cast %0 : vector<1x128x8xf32> to vector<128x8xf32>
    %c0_2 = arith.constant 0 : index
    %c0_3 = arith.constant 0 : index
    %c0_4 = arith.constant 0 : index
    %2 = vector.load %arg2[%c0_2, %c0_3, %c0_4] : memref<1x128x128xf32, #tpu.memory_space<vmem>>, vector<1x128x128xf32>
    %3 = vector.shape_cast %2 : vector<1x128x128xf32> to vector<128x128xf32>
    %c0_5 = arith.constant 0 : index
    %c0_6 = arith.constant 0 : index
    %4 = vector.load %arg4[%c0_5, %c0_6] : memref<8x128xf32, #tpu.memory_space<vmem>>, vector<8x128xf32>
    %cst = arith.constant dense<0.000000e+00> : vector<128x128xf32>
    %5 = tpu.matmul %1, %4, %cst {dimension_numbers = #tpu.dot_dimension_numbers<[1], [0], [0], [1], [0, 0, 1, 1], [], []>} : vector<128x8xf32>, vector<8x128xf32>, vector<128x128xf32> -> vector<128x128xf32>
    %cst_7 = arith.constant dense<0.000000e+00> : vector<128x128xf32>
    %6 = tpu.matmul %3, %5, %cst_7 {dimension_numbers = #tpu.dot_dimension_numbers<[1], [0], [0], [1], [0, 0, 1, 1], [], []>} : vector<128x128xf32>, vector<128x128xf32>, vector<128x128xf32> -> vector<128x128xf32>
    %c0_8 = arith.constant 0 : index
    %c0_9 = arith.constant 0 : index
    %7 = vector.load %arg5[%c0_8, %c0_9] : memref<1x128xf32, #tpu.memory_space<vmem>>, vector<1x128xf32>
    %8 = vector.broadcast %7 : vector<1x128xf32> to vector<128x128xf32>
    %9 = arith.addf %6, %8 : vector<128x128xf32>
    %cst_10 = arith.constant 0.000000e+00 : f32
    %10 = vector.broadcast %cst_10 : f32 to vector<128x128xf32>
    %11 = arith.maximumf %9, %10 : vector<128x128xf32>
    %c0_11 = arith.constant 0 : index
    %c0_12 = arith.constant 0 : index
    %12 = vector.load %arg6[%c0_11, %c0_12] : memref<128x128xf32, #tpu.memory_space<vmem>>, vector<128x128xf32>
    %cst_13 = arith.constant dense<0.000000e+00> : vector<128x128xf32>
    %13 = tpu.matmul %11, %12, %cst_13 {dimension_numbers = #tpu.dot_dimension_numbers<[1], [0], [0], [1], [0, 0, 1, 1], [], []>} : vector<128x128xf32>, vector<128x128xf32>, vector<128x128xf32> -> vector<128x128xf32>
    %cst_14 = arith.constant dense<0.000000e+00> : vector<128x128xf32>
    %14 = tpu.matmul %3, %13, %cst_14 {dimension_numbers = #tpu.dot_dimension_numbers<[1], [0], [0], [1], [0, 0, 1, 1], [], []>} : vector<128x128xf32>, vector<128x128xf32>, vector<128x128xf32> -> vector<128x128xf32>
    %c0_15 = arith.constant 0 : index
    %c0_16 = arith.constant 0 : index
    %15 = vector.load %arg7[%c0_15, %c0_16] : memref<1x128xf32, #tpu.memory_space<vmem>>, vector<1x128xf32>
    %16 = vector.broadcast %15 : vector<1x128xf32> to vector<128x128xf32>
    %17 = arith.addf %14, %16 : vector<128x128xf32>
    %c0_17 = arith.constant 0 : index
    %c0_18 = arith.constant 0 : index
    %c0_19 = arith.constant 0 : index
    %18 = vector.load %arg3[%c0_17, %c0_18, %c0_19] : memref<1x8x8xf32, #tpu.memory_space<vmem>>, vector<1x8x8xf32>
    %19 = vector.shape_cast %18 : vector<1x8x8xf32> to vector<8x8xf32>
    %c0_20 = arith.constant 0 : index
    %c0_21 = arith.constant 0 : index
    %20 = vector.load %arg8[%c0_20, %c0_21] : memref<8x128xf32, #tpu.memory_space<vmem>>, vector<8x128xf32>
    %cst_22 = arith.constant dense<0.000000e+00> : vector<8x128xf32>
    %21 = tpu.matmul %19, %20, %cst_22 {dimension_numbers = #tpu.dot_dimension_numbers<[1], [0], [0], [1], [0, 0, 1, 1], [], []>} : vector<8x8xf32>, vector<8x128xf32>, vector<8x128xf32> -> vector<8x128xf32>
    %c0_23 = arith.constant 0 : index
    %c0_24 = arith.constant 0 : index
    %22 = vector.load %arg9[%c0_23, %c0_24] : memref<1x128xf32, #tpu.memory_space<vmem>>, vector<1x128xf32>
    %23 = vector.broadcast %22 : vector<1x128xf32> to vector<8x128xf32>
    %24 = arith.addf %21, %23 : vector<8x128xf32>
    %cst_25 = arith.constant 0.000000e+00 : f32
    %25 = vector.broadcast %cst_25 : f32 to vector<8x128xf32>
    %26 = arith.maximumf %24, %25 : vector<8x128xf32>
    %c0_26 = arith.constant 0 : index
    %c0_27 = arith.constant 0 : index
    %27 = vector.load %arg10[%c0_26, %c0_27] : memref<128x128xf32, #tpu.memory_space<vmem>>, vector<128x128xf32>
    %cst_28 = arith.constant dense<0.000000e+00> : vector<8x128xf32>
    %28 = tpu.matmul %26, %27, %cst_28 {dimension_numbers = #tpu.dot_dimension_numbers<[1], [0], [0], [1], [0, 0, 1, 1], [], []>} : vector<8x128xf32>, vector<128x128xf32>, vector<8x128xf32> -> vector<8x128xf32>
    %c0_29 = arith.constant 0 : index
    %c0_30 = arith.constant 0 : index
    %29 = vector.load %arg11[%c0_29, %c0_30] : memref<1x128xf32, #tpu.memory_space<vmem>>, vector<1x128xf32>
    %30 = vector.broadcast %29 : vector<1x128xf32> to vector<8x128xf32>
    %31 = arith.addf %28, %30 : vector<8x128xf32>
    %32 = vector.shape_cast %17 : vector<128x128xf32> to vector<8x16x128xf32>
    %33 = vector.shape_cast %31 : vector<8x128xf32> to vector<8x1x128xf32>
    %34 = vector.broadcast %33 : vector<8x1x128xf32> to vector<8x16x128xf32>
    %35 = arith.addf %32, %34 : vector<8x16x128xf32>
    %36 = vector.shape_cast %35 : vector<8x16x128xf32> to vector<128x128xf32>
    %c0_31 = arith.constant 0 : index
    %c0_32 = arith.constant 0 : index
    %37 = vector.load %arg12[%c0_31, %c0_32] : memref<128x128xf32, #tpu.memory_space<vmem>>, vector<128x128xf32>
    %cst_33 = arith.constant dense<0.000000e+00> : vector<128x128xf32>
    %38 = tpu.matmul %36, %37, %cst_33 {dimension_numbers = #tpu.dot_dimension_numbers<[1], [0], [0], [1], [0, 0, 1, 1], [], []>} : vector<128x128xf32>, vector<128x128xf32>, vector<128x128xf32> -> vector<128x128xf32>
    %c0_34 = arith.constant 0 : index
    %c0_35 = arith.constant 0 : index
    %39 = vector.load %arg13[%c0_34, %c0_35] : memref<1x128xf32, #tpu.memory_space<vmem>>, vector<1x128xf32>
    %40 = vector.broadcast %39 : vector<1x128xf32> to vector<128x128xf32>
    %41 = arith.addf %38, %40 : vector<128x128xf32>
    %cst_36 = arith.constant 0.000000e+00 : f32
    %42 = vector.broadcast %cst_36 : f32 to vector<128x128xf32>
    %43 = arith.maximumf %41, %42 : vector<128x128xf32>
    %c0_37 = arith.constant 0 : index
    %c0_38 = arith.constant 0 : index
    %44 = vector.load %arg14[%c0_37, %c0_38] : memref<1x128xf32, #tpu.memory_space<vmem>>, vector<1x128xf32>
    %45 = vector.broadcast %44 : vector<1x128xf32> to vector<128x128xf32>
    %46 = arith.mulf %43, %45 : vector<128x128xf32>
    %cst_39 = arith.constant dense<0.000000e+00> : vector<128xf32>
    %47 = vector.multi_reduction <add>, %46, %cst_39 [1] : vector<128x128xf32> to vector<128xf32>
    %c0_40 = arith.constant 0 : index
    %c0_41 = arith.constant 0 : index
    %48 = memref.load %arg15[%c0_40, %c0_41] : memref<1x1xf32, #tpu.memory_space<smem>>
    %49 = vector.broadcast %48 : f32 to vector<128xf32>
    %50 = arith.addf %47, %49 : vector<128xf32>
    %51 = vector.shape_cast %50 : vector<128xf32> to vector<1x1x128xf32>
    %c0_42 = arith.constant 0 : index
    %c0_43 = arith.constant 0 : index
    %c0_44 = arith.constant 0 : index
    %52 = vector.load %arg16[%c0_42, %c0_43, %c0_44] : memref<1x1x128xf32, #tpu.memory_space<vmem>>, vector<1x1x128xf32>
    tpu.vector_store %arg16[%c0_42, %c0_43, %c0_44], %51 {strides = array<i32>} : memref<1x1x128xf32, #tpu.memory_space<vmem>>, vector<1x1x128xf32>,
    return
  }
  func.func @transform_0(%arg0: i32) -> (i32, i32, i32) {
    %c0_i32 = arith.constant 0 : i32
    %c0_i32_0 = arith.constant 0 : i32
    %c0_i32_1 = arith.constant 0 : i32
    return %arg0, %c0_i32, %c0_i32_0 : i32, i32, i32
  }
  func.func @transform_1(%arg0: i32) -> (i32, i32, i32) {
    %c0_i32 = arith.constant 0 : i32
    %c0_i32_0 = arith.constant 0 : i32
    %c0_i32_1 = arith.constant 0 : i32
    return %arg0, %c0_i32, %c0_i32_0 : i32, i32, i32
  }
  func.func @transform_2(%arg0: i32) -> (i32, i32, i32) {
    %c0_i32 = arith.constant 0 : i32
    %c0_i32_0 = arith.constant 0 : i32
    %c0_i32_1 = arith.constant 0 : i32
    return %arg0, %c0_i32, %c0_i32_0 : i32, i32, i32
  }
  func.func @transform_3(%arg0: i32) -> (i32, i32) {
    %c0_i32 = arith.constant 0 : i32
    %c0_i32_0 = arith.constant 0 : i32
    %c0_i32_1 = arith.constant 0 : i32
    return %c0_i32, %c0_i32_0 : i32, i32
  }
  func.func @transform_4(%arg0: i32) -> (i32, i32) {
    %c0_i32 = arith.constant 0 : i32
    %c0_i32_0 = arith.constant 0 : i32
    %c0_i32_1 = arith.constant 0 : i32
    return %c0_i32, %c0_i32_0 : i32, i32
  }
  func.func @transform_5(%arg0: i32) -> (i32, i32) {
    %c0_i32 = arith.constant 0 : i32
    %c0_i32_0 = arith.constant 0 : i32
    %c0_i32_1 = arith.constant 0 : i32
    return %c0_i32, %c0_i32_0 : i32, i32
  }
  func.func @transform_6(%arg0: i32) -> (i32, i32) {
    %c0_i32 = arith.constant 0 : i32
    %c0_i32_0 = arith.constant 0 : i32
    %c0_i32_1 = arith.constant 0 : i32
    return %c0_i32, %c0_i32_0 : i32, i32
  }
  func.func @transform_7(%arg0: i32) -> (i32, i32) {
    %c0_i32 = arith.constant 0 : i32
    %c0_i32_0 = arith.constant 0 : i32
    %c0_i32_1 = arith.constant 0 : i32
    return %c0_i32, %c0_i32_0 : i32, i32
  }
  func.func @transform_8(%arg0: i32) -> (i32, i32) {
    %c0_i32 = arith.constant 0 : i32
    %c0_i32_0 = arith.constant 0 : i32
    %c0_i32_1 = arith.constant 0 : i32
    return %c0_i32, %c0_i32_0 : i32, i32
  }
  func.func @transform_9(%arg0: i32) -> (i32, i32) {
    %c0_i32 = arith.constant 0 : i32
    %c0_i32_0 = arith.constant 0 : i32
    %c0_i32_1 = arith.constant 0 : i32
    return %c0_i32, %c0_i32_0 : i32, i32
  }
  func.func @transform_10(%arg0: i32) -> (i32, i32) {
    %c0_i32 = arith.constant 0 : i32
    %c0_i32_0 = arith.constant 0 : i32
    %c0_i32_1 = arith.constant 0 : i32
    return %c0_i32, %c0_i32_0 : i32, i32
  }
  func.func @transform_11(%arg0: i32) -> (i32, i32) {
    %c0_i32 = arith.constant 0 : i32
    %c0_i32_0 = arith.constant 0 : i32
    %c0_i32_1 = arith.constant 0 : i32
    return %c0_i32, %c0_i32_0 : i32, i32
  }
  func.func @transform_12(%arg0: i32) -> (i32, i32) {
    %c0_i32 = arith.constant 0 : i32
    %c0_i32_0 = arith.constant 0 : i32
    %c0_i32_1 = arith.constant 0 : i32
    return %c0_i32, %c0_i32_0 : i32, i32
  }
  func.func @transform_13(%arg0: i32) -> (i32, i32) {
    %c0_i32 = arith.constant 0 : i32
    %c0_i32_0 = arith.constant 0 : i32
    %c0_i32_1 = arith.constant 0 : i32
    return %c0_i32, %c0_i32_0 : i32, i32
  }
  func.func @transform_14(%arg0: i32) -> (i32, i32) {
    %c0_i32 = arith.constant 0 : i32
    %c0_i32_0 = arith.constant 0 : i32
    %c0_i32_1 = arith.constant 0 : i32
    return %c0_i32, %c0_i32_0 : i32, i32
  }
  func.func @transform_15(%arg0: i32) -> (i32, i32, i32) {
    %c0_i32 = arith.constant 0 : i32
    %c0_i32_0 = arith.constant 0 : i32
    %c0_i32_1 = arith.constant 0 : i32
    return %arg0, %c0_i32, %c0_i32_0 : i32, i32, i32
  }
}

</mosaic_0001>

<bundles_post_ra>
// kernel: tpu_custom_call.1
= control target key start
LH: loop header
LB: loop body
LE: loop exit
PB: predicated region body
PF: predicated region fallthrough
CT: control target
= control target key end

     0   :  { %s3420_s0 = inlined_call_operand.vmem [shape: f32[2,128,8], index: 0, kind: input, shape index: {}]   ;;  %s3421_s1 = inlined_call_operand.vmem [shape: f32[2,128,128], index: 1, kind: input, shape index: {}]   ;;  %s3422_s2 = inlined_call_operand.vmem [shape: f32[2,8,8], index: 2, kind: input, shape index: {}]   ;;  %s3423_s3 = inlined_call_operand.hbm [shape: f32[8,128], index: 3, kind: input, shape index: {}]   ;;  %s3424_s4 = inlined_call_operand.vmem [shape: f32[1,128], index: 4, kind: input, shape index: {}]   ;;  %s3425_s5 = inlined_call_operand.hbm [shape: f32[128,128], index: 5, kind: input, shape index: {}]   ;;  %s3426_s6 = inlined_call_operand.vmem [shape: f32[1,128], index: 6, kind: input, shape index: {}]   ;;  %s3427_s7 = inlined_call_operand.vmem [shape: f32[8,128], index: 7, kind: input, shape index: {}]   ;;  %s3428_s8 = inlined_call_operand.vmem [shape: f32[1,128], index: 8, kind: input, shape index: {}]   ;;  %s3429_s9 = inlined_call_operand.hbm [shape: f32[128,128], index: 9, kind: input, shape index: {}]   ;;  %s3430_s10 = inlined_call_operand.vmem [shape: f32[1,128], index: 10, kind: input, shape index: {}]   ;;  %s3431_s11 = inlined_call_operand.hbm [shape: f32[128,128], index: 11, kind: input, shape index: {}]   ;;  %s3432_s12 = inlined_call_operand.vmem [shape: f32[1,128], index: 12, kind: input, shape index: {}]   ;;  %s3433_s13 = inlined_call_operand.vmem [shape: f32[1,128], index: 13, kind: input, shape index: {}]   ;;  %s3434_s14 = inlined_call_operand.<no memory space> [shape: f32[1,1], index: 14, kind: input, shape index: {}]   ;;  %s3435_s15 = inlined_call_operand.hbm [shape: f32[2,1,128], index: 15, kind: output, shape index: {}]  }
   0x1   :  { %20 = sst [smem:[#allocation2]] %s3434_s14 }
   0x2   :  { %21 = vsyncpa [#allocation4], 0 }
   0x3   :  { %22 = vsyncpa [#allocation7], 0 }
   0x4   :  { %23 = vsyncpa [#allocation10], 0 }
   0x5   :  { %24 = vsyncpa [#allocation5], 0 }
   0x6   :  { %26 = vsyncpa [#allocation5 + $0x1], 0  ;;  %s2951_s20 = smov 0   ;;  %s2953_s21 = smov 0  }
   0x7   :  { %s2955_s22 = smov 0   ;;  %s2957_s23 = smov 0  }
   0x8 LB: > { %3443 = sst [smem:[#allocation16_spill]] %s2844_s20  ;;  %s2972_s14 = sadd.s32 4294967295, %s2856_s23   ;;  %s2856_s23 = sphi %s2957_s23, %s3462_s23   ;;  %s2852_s22 = sphi %s2955_s22, %s3464_s22   ;;  %s2848_s21 = sphi %s2953_s21, %s3466_s21   ;;  %s2844_s20 = sphi %s2951_s20, %s3465_s20  }
   0x9   : > { %3444 = sst [smem:[#allocation17_spill]] %s2852_s22  ;;  %s2096_s24 = sadd.s32 4294967294, %s2856_s23  }
   0xa   : > { %s2976_s25 = sadd.s32 1, %s2856_s23   ;;  %s369_s26 = sadd.s32 1, %s2852_s22 }
   0xb   : > { %3445 = sst [smem:[#allocation18_spill]] %s2976_s25  ;;  %s366_s27 = ssub.s32 %s2856_s23, %s2976_s25 }
   0xc   : > { %p379_p0 = scmp.ne.s32.totalorder %s2852_s22, %s2848_s21  ;;  %p367_p1 = scmp.eq.s32.totalorder %s366_s27, 0 }
   0xd   : > { %p380_p2 = scmp.eq.s32.totalorder %s2972_s14, 1  ;;  %p385_p3 = scmp.ne.s32.totalorder %s2848_s21, %s2844_s20 }
   0xe   : > { %p386_p4 = scmp.eq.s32.totalorder %s2096_s24, 1  ;;  %p2097_p7 = scmp.ge.s32.totalorder %s2856_s23, 1 }
   0xf   : > { %s2987_s28 = scalar_select %p367_p1, %s2852_s22, %s369_s26  }
  0x10   : > { %p2989_p5 = por %p380_p2, %p379_p0  ;;  %p2993_p6 = por %p386_p4, %p385_p3 }
  0x11   : > { %3446 = sst [smem:[#allocation19_spill]] %s2987_s28  ;;  %p393_p8 = scmp.lt.s32.totalorder %s2856_s23, 3 }
  0x12   : > { %s3447_s29 = scalar_select %p2989_p5, 1, 0 }
  0x13   : > { %s3448_s30 = scalar_select %p2993_p6, 1, 0 }
  0x14   : > { %p3441_p9 = scmp.eq.s32.totalorder %s2972_s14, 0  ;;  %p3000_p10 = pnand %p2097_p7, %p393_p8 }
  0x15   : > { %3449 = sst [smem:[#allocation20_spill]] %s3448_s30  ;;  %s2858_s17 = smov [#allocation6]  }
  0x16   : > { %s419_s18 = sshll.u32 %s2858_s17, 4  ;;  %p2613_p11 = pneg %p3000_p10  ;;  %s420_s18 = int_to_ptr.vmem [resolvable:$true] %s419_s18 }
  0x17   : > { %s2859_s24 = smov [#allocation3]   ;;  %s2860_s27 = smov [#allocation8]  }
  0x18   : > { %p3008_p12 = pnand %p3441_p9, %p2613_p11  ;;  %s406_s26 = sshll.u32 %s2859_s24, 4  ;;  %s407_s26 = int_to_ptr.vmem [resolvable:$true] %s406_s26 }
  0x19   : > { %s441_s28 = sshll.u32 %s2860_s27, 4  ;;  %s2691_s22 = scalar_lea.vmem %s420_s18, 2048  ;;  %s442_s28 = int_to_ptr.vmem [resolvable:$true] %s441_s28 }
  0x1a   : > { %p2682_p13 = pneg %p3008_p12  ;;  %p2692_p0 = scmp.ne.s32.totalorder %s420_s18, %s2691_s22 }
  0x1b   : > { %p2699_p3 = scmp.lt.s32.totalorder %s420_s18, %s420_s18  ;;  %p2700_p4 = scmp.lt.s32.totalorder %s2691_s22, %s2691_s22 }
  0x1c   : > { %p2694_p1 = pnand %p2692_p0, %p2682_p13 }
  0x1d   : > { %p2701_p7 = por %p2700_p4, %p2699_p3 }
  0x1e   : > { %p2695_p2 = pneg %p2694_p1 }
  0x20   : > { %p2702_p8 = pnand %p2701_p7, %p2695_p2 }
  0x22   : > { %2705 = shalt.err (!%p2702_p8)
}
  0x23   : > { %s2861_s17 = smov 128   ;;  %s2862_s24 = smov 8  }
  0x24   : > { %2619 = dma.hbm_to_vmem [thread:$0]  (!%p3008_p12), %s3425_s5, 2048, %s420_s18, [#allocation7], %s2861_s17, %s2861_s17, %s2862_s24  }
  0x25   : > { %s2717_s30 = scalar_lea.vmem %s407_s26, 128  ;;  %p2725_p2 = scmp.lt.s32.totalorder %s407_s26, %s407_s26 }
  0x26   : > { %p2718_p11 = scmp.ne.s32.totalorder %s407_s26, %s2717_s30  ;;  %p2726_p3 = scmp.lt.s32.totalorder %s2717_s30, %s2717_s30 }
  0x28   : > { %p2720_p0 = pnand %p2718_p11, %p2682_p13  ;;  %p2727_p4 = por %p2726_p3, %p2725_p2 }
  0x2a   : > { %p2721_p1 = pneg %p2720_p0 }
  0x2c   : > { %p2728_p7 = pnand %p2727_p4, %p2721_p1 }
  0x2e   : > { %2731 = shalt.err (!%p2728_p7)
}
  0x2f   : > { %2616 = dma.hbm_to_vmem [thread:$0]  (!%p3008_p12), %s3423_s3, 128, %s407_s26, [#allocation4]  }
  0x30   : > { %s2743_s25 = scalar_lea.vmem %s442_s28, 2048  ;;  %p2751_p0 = scmp.lt.s32.totalorder %s442_s28, %s442_s28 }
  0x31   : > { %p2744_p8 = scmp.ne.s32.totalorder %s442_s28, %s2743_s25  ;;  %p2752_p6 = scmp.lt.s32.totalorder %s2743_s25, %s2743_s25 }
  0x33   : > { %p2746_p9 = pnand %p2744_p8, %p2682_p13  ;;  %p2753_p5 = por %p2752_p6, %p2751_p0 }
  0x35   : > { %p2747_p11 = pneg %p2746_p9 }
  0x37   : > { %p2754_p2 = pnand %p2753_p5, %p2747_p11 }
  0x39   : > { %2757 = shalt.err (!%p2754_p2)
}
  0x3a   : > { %2622 = dma.hbm_to_vmem [thread:$0]  (!%p3008_p12), %s3429_s9, 2048, %s442_s28, [#allocation7], %s2861_s17, %s2861_s17, %s2862_s24  }
  0x3b   : > { %s2863_s18 = smov [#allocation9]  }
  0x3c   : > { %s457_s26 = sshll.u32 %s2863_s18, 4  ;;  %s458_s26 = int_to_ptr.vmem [resolvable:$true] %s457_s26 }
  0x3d   : > { %s2769_s27 = scalar_lea.vmem %s458_s26, 2048  ;;  %p2777_p1 = scmp.lt.s32.totalorder %s458_s26, %s458_s26 }
  0x3e   : > { %p2770_p9 = scmp.ne.s32.totalorder %s458_s26, %s2769_s27  ;;  %p2778_p3 = scmp.lt.s32.totalorder %s2769_s27, %s2769_s27 }
  0x40   : > { %p2772_p6 = pnand %p2770_p9, %p2682_p13  ;;  %p2779_p4 = por %p2778_p3, %p2777_p1 }
  0x42   : > { %p2773_p5 = pneg %p2772_p6 }
  0x44   : > { %p2780_p7 = pnand %p2779_p4, %p2773_p5 }
  0x46   : > { %2783 = shalt.err (!%p2780_p7)
}
  0x47   : > { %2625 = dma.hbm_to_vmem [thread:$0]  (!%p3008_p12), %s3431_s11, 2048, %s458_s26, [#allocation10], %s2861_s17, %s2861_s17, %s2862_s24  }
  0x48   : > { %505 = sbr.rel (%p3000_p10) target bundleno = 1422 (0x58e), region = 80  ;;  %p3452_p13 = scmp.eq.s32.totalorder (!%p3000_p10), %s2972_s14, 0 }
  0x4d   : > { %2827 = dma.done.wait (%p3452_p13), [#allocation4], 128   ;;  %p3453_p8 = pmov %p3452_p13 }
  0x4f   : > { %2829 = vsyncadd (%p3453_p8), [#allocation4], 4294967168  ;;  %p3454_p11 = pmov %p3453_p8 }
  0x50   : > { %p3455_p0 = pmov %p3453_p8 }
  0x51   : > { %2831 = dma.done.wait (%p3454_p11), [#allocation7], 4096  }
  0x52   : > { %2833 = vsyncadd (%p3455_p0), [#allocation7], 4294963200  ;;  %p3456_p2 = pmov %p3455_p0 }
  0x53   : > { %p3457_p12 = pmov %p3455_p0 }
  0x54   : > { %2835 = dma.done.wait (%p3456_p2), [#allocation10], 2048  }
  0x55   : > { %2837 = vsyncadd (%p3457_p12), [#allocation10], 4294965248  ;;  %p573_p10 = scmp.lt.s32.totalorder %s2972_s14, 1  ;;  %vm620_vm0 = vcmask 64512   ;;  %v619_v0 = vld [vmem:[#allocation3] sm:$0xff]  ;;  %v996_v19 = vld [vmem:[#allocation6 + $0x70] sm:$0xff] }
  0x56   : > { %2305 = vmatprep.subr.mxu1 %v619_v0  ;;  %v997_v18 = vld [vmem:[#allocation6 + $0x78] sm:$0xff]  ;;  %v995_v20 = vld [vmem:[#allocation6 + $0x68] sm:$0xff]  ;;  %v994_v21 = vld [vmem:[#allocation6 + $0x60] sm:$0xff]  ;;  %vm2865_vm1 = vmmov 0   ;;  %s1816_s24 = sld [smem:[#allocation2]]  ;;  %vm1861_vm2 = vcmask 130112  }
  0x57   : > { %s3071_s16 = scalar_select %p573_p10, %s2972_s14, 1  ;;  %2306 = vmatpush3.msra.mxu1 %v619_v0  ;;  %2387 = vmatprep.subr.mxu0 %v997_v18  ;;  %v993_v22 = vld [vmem:[#allocation6 + $0x58] sm:$0xff]  ;;  %v992_v23 = vld [vmem:[#allocation6 + $0x50] sm:$0xff]  ;;  %v991_v24 = vld [vmem:[#allocation6 + $0x48] sm:$0xff]  ;;  %vm1868_vm3 = vcmask 195712   ;;  %vm1875_vm4 = vcmask 261312  }
  0x58   : > { %2388 = vmatpush3.msra.mxu0 %v997_v18  ;;  %v990_v25 = vld [vmem:[#allocation6 + $0x40] sm:$0xff]  ;;  %v989_v26 = vld [vmem:[#allocation6 + $0x38] sm:$0xff]  ;;  %v988_v27 = vld [vmem:[#allocation6 + $0x30] sm:$0xff]  ;;  %vm1882_vm5 = vcmask 326912   ;;  %vm1889_vm6 = vcmask 392512   ;;  %vm1896_vm7 = vcmask 458112  }
  0x59   : > { %s2139_s19 = sshll.u32 %s3071_s16, 7  ;;  %2389 = vmatprep.subr.mxu0 %v996_v19  ;;  %v987_v28 = vld [vmem:[#allocation6 + $0x28] sm:$0xff]  ;;  %v986_v29 = vld [vmem:[#allocation6 + $0x20] sm:$0xff]  ;;  %v985_v61 = vld [vmem:[#allocation6 + $0x18] sm:$0xff]  ;;  %vm1903_vm8 = vcmask 523712   ;;  %vm1910_vm9 = vcmask 589312  }
  0x5a   : > { %s3079_s25 = scalar_lea.vmem %s3420_s0, %s2139_s19  ;;  %s3118_s18 = scalar_lea.vmem %s3421_s1, %s2139_s19  ;;  %2390 = vmatpush3.msra.mxu0 %v996_v19  ;;  %v984_v62 = vld [vmem:[#allocation6 + $0x10] sm:$0xff]  ;;  %v983_v63 = vld [vmem:[#allocation6 + $0x8] sm:$0xff]  ;;  %v982_v0 = vld [vmem:[#allocation6] sm:$0xff]  ;;  %vm1917_vm10 = vcmask 654912   ;;  %vm1924_vm11 = vcmask 720512   ;;  %vm1931_vm12 = vcmask 786112  }
  0x5b   : > { %v587_v1 = vld [vmem:[%s3079_s25] sm:$0xff]  ;;  %v588_v2 = vld [vmem:[%s3079_s25 + $0x8] sm:$0xff]  ;;  %v589_v3 = vld [vmem:[%s3079_s25 + $0x10] sm:$0xff]  ;;  %2391 = vmatprep.subr.mxu0 %v995_v20  ;;  %s2112_s19 = sshll.u32 %s3071_s16, 3  ;;  %vm1938_vm13 = vcmask 851712   ;;  %vm1945_vm14 = vcmask 917312  }
  0x5c   : > { %2307 = vmatprep.mubr.msk.f32.mxu1 %vm620_vm0, %v587_v1  ;;  %v590_v4 = vld [vmem:[%s3079_s25 + $0x18] sm:$0xff]  ;;  %v591_v5 = vld [vmem:[%s3079_s25 + $0x20] sm:$0xff]  ;;  %v592_v6 = vld [vmem:[%s3079_s25 + $0x28] sm:$0xff]  ;;  %2392 = vmatpush3.msra.mxu0 %v995_v20  ;;  %v2864_v1 = vmov 0.0   ;;  %vm1952_vm15 = vcmask 982912   ;;  %s2136_s16 = sshll.u32 %s2972_s14, 4 }
  0x5d   : > { %2308 = vmatmul.mubr.msk.f32.vlgmr.msra.gmra.mxu1 %vm620_vm0, %v588_v2  ;;  %v593_v7 = vld [vmem:[%s3079_s25 + $0x30] sm:$0xff]  ;;  %v594_v8 = vld [vmem:[%s3079_s25 + $0x38] sm:$0xff]  ;;  %v595_v9 = vld [vmem:[%s3079_s25 + $0x40] sm:$0xff]  ;;  %2393 = vmatprep.subr.mxu0 %v994_v21  ;;  %s3385_s27 = scalar_lea.hbm %s3435_s15, %s2136_s16  ;;  %p3458_p6 = scmp.ne.s32.totalorder %s3447_s29, 0 }
  0x5e   : > { %2310 = vmatprep.mubr.msk.f32.mxu1 %vm620_vm0, %v589_v3  ;;  %v596_v10 = vld [vmem:[%s3079_s25 + $0x48] sm:$0xff]  ;;  %v597_v11 = vld [vmem:[%s3079_s25 + $0x50] sm:$0xff]  ;;  %v598_v12 = vld [vmem:[%s3079_s25 + $0x58] sm:$0xff]  ;;  %2394 = vmatpush3.msra.mxu0 %v994_v21  ;;  %s2867_s14 = smov [#allocation11]  }
  0x5f   : > { %v599_v13 = vld [vmem:[%s3079_s25 + $0x60] sm:$0xff]  ;;  %v600_v14 = vld [vmem:[%s3079_s25 + $0x68] sm:$0xff]  ;;  %v601_v15 = vld [vmem:[%s3079_s25 + $0x70] sm:$0xff]  ;;  %2395 = vmatprep.subr.mxu0 %v993_v22 }
  0x60   : > { %v602_v16 = vld [vmem:[%s3079_s25 + $0x78] sm:$0xff]  ;;  %v3121_v17 = vld [vmem:[%s3118_s18] sm:$0xff]  ;;  %2396 = vmatpush3.msra.mxu0 %v993_v22  ;;  %v3125_v46 = vld [vmem:[%s3118_s18 + $0x8] sm:$0xff]  ;;  %s586_s25 = scalar_lea.vmem %s3422_s2, %s2112_s19  ;;  %s2788_s19 = sshll.u32 %s2867_s14, 4  ;;  %s2789_s19 = int_to_ptr.vmem [resolvable:$false] %s2788_s19 }
  0x61   : > { %2311 = vmatmul.mubr.msk.f32.gmra.mxu1 %vm620_vm0, %v590_v4  ;;  %2397 = vmatprep.subr.mxu0 %v992_v23  ;;  %v3128_v47 = vld [vmem:[%s3118_s18 + $0x10] sm:$0xff]  ;;  %v3133_v48 = vld [vmem:[%s3118_s18 + $0x18] sm:$0xff]  ;;  %v3136_v49 = vld [vmem:[%s3118_s18 + $0x20] sm:$0xff]  ;;  %s2790_s17 = scalar_lea.vmem %s2789_s19, 32 }
  0x62   : > { %2313 = vmatprep.mubr.msk.f32.mxu1 %vm620_vm0, %v591_v5  ;;  %2398 = vmatpush3.msra.mxu0 %v992_v23  ;;  %v3141_v50 = vld [vmem:[%s3118_s18 + $0x28] sm:$0xff]  ;;  %v3144_v51 = vld [vmem:[%s3118_s18 + $0x30] sm:$0xff]  ;;  %v3149_v52 = vld [vmem:[%s3118_s18 + $0x38] sm:$0xff] }
  0x63   : > { %2399 = vmatprep.subr.mxu0 %v991_v24  ;;  %v3152_v53 = vld [vmem:[%s3118_s18 + $0x40] sm:$0xff]  ;;  %v3157_v54 = vld [vmem:[%s3118_s18 + $0x48] sm:$0xff]  ;;  %v3160_v55 = vld [vmem:[%s3118_s18 + $0x50] sm:$0xff] }
  0x64   : > { %2400 = vmatpush3.msra.mxu0 %v991_v24  ;;  %v3165_v56 = vld [vmem:[%s3118_s18 + $0x58] sm:$0xff]  ;;  %v3168_v57 = vld [vmem:[%s3118_s18 + $0x60] sm:$0xff]  ;;  %v3173_v58 = vld [vmem:[%s3118_s18 + $0x68] sm:$0xff] }
  0x65   : > { %2314 = vmatmul.mubr.msk.f32.gmra.mxu1 %vm620_vm0, %v592_v6  ;;  %2401 = vmatprep.subr.mxu0 %v990_v25  ;;  %v3176_v59 = vld [vmem:[%s3118_s18 + $0x70] sm:$0xff]  ;;  %v3181_v60 = vld [vmem:[%s3118_s18 + $0x78] sm:$0xff]  ;;  %v2129_v2 = vld [vmem:[%s3424_s4] ss:$0 sm:$0xff] }
  0x66   : > { %2316 = vmatprep.mubr.msk.f32.mxu1 %vm620_vm0, %v593_v7  ;;  %2402 = vmatpush3.msra.mxu0 %v990_v25 }
  0x67   : > { %2403 = vmatprep.subr.mxu0 %v989_v26 }
  0x68   : > { %2404 = vmatpush3.msra.mxu0 %v989_v26 }
  0x69   : > { %2317 = vmatmul.mubr.msk.f32.gmra.mxu1 %vm620_vm0, %v594_v8  ;;  %2405 = vmatprep.subr.mxu0 %v988_v27 }
  0x6a   : > { %2319 = vmatprep.mubr.msk.f32.mxu1 %vm620_vm0, %v595_v9  ;;  %2406 = vmatpush3.msra.mxu0 %v988_v27 }
  0x6b   : > { %2407 = vmatprep.subr.mxu0 %v987_v28 }
  0x6c   : > { %2408 = vmatpush3.msra.mxu0 %v987_v28 }
  0x6d   : > { %2320 = vmatmul.mubr.msk.f32.gmra.mxu1 %vm620_vm0, %v596_v10  ;;  %2409 = vmatprep.subr.mxu0 %v986_v29 }
  0x6e   : > { %2322 = vmatprep.mubr.msk.f32.mxu1 %vm620_vm0, %v597_v11  ;;  %2410 = vmatpush3.msra.mxu0 %v986_v29 }
  0x6f   : > { %2411 = vmatprep.subr.mxu0 %v985_v61 }
  0x70   : > { %2412 = vmatpush3.msra.mxu0 %v985_v61 }
  0x71   : > { %2323 = vmatmul.mubr.msk.f32.gmra.mxu1 %vm620_vm0, %v598_v12  ;;  %2413 = vmatprep.subr.mxu0 %v984_v62  ;;  %v1296_v12 = vld [vmem:[%s3427_s7] sm:$0xff] }
  0x72   : > { %2325 = vmatprep.mubr.msk.f32.mxu1 %vm620_vm0, %v599_v13  ;;  %2414 = vmatpush3.msra.mxu0 %v984_v62 }
  0x73   : > { %2415 = vmatprep.subr.mxu0 %v983_v63 }
  0x74   : > { %2416 = vmatpush3.msra.mxu0 %v983_v63 }
  0x75   : > { %2326 = vmatmul.mubr.msk.f32.gmra.mxu1 %vm620_vm0, %v600_v14  ;;  %2417 = vmatprep.subr.mxu0 %v982_v0 }
  0x76   : > { %2328 = vmatprep.mubr.msk.f32.mxu1 %vm620_vm0, %v601_v15  ;;  %2418 = vmatpush3.msra.mxu0 %v982_v0 }
  0x77   : > { %2499 = vmatprep.subr.mxu0 %v2864_v1 }
  0x79   : > { %2329 = vmatmul.mubr.msk.f32.gmra.mxu1 %vm620_vm0, %v602_v16 }
  0x7a   : > { %2363 = vmatprep.mubr.f32.mxu1 %v3121_v17 }
 0x11d   : > { %v2309_v30 = vpop.f32.mrf.mxu1 }
 0x11f   : > { %v735_v31 = vpop.f32.mrf.mxu1 }
 0x121   : > { %v2312_v32 = vpop.f32.mrf.mxu1 }
 0x123   : > { %v745_v33 = vpop.f32.mrf.mxu1 }
 0x125   : > { %v2315_v34 = vpop.f32.mrf.mxu1 }
 0x127   : > { %v755_v35 = vpop.f32.mrf.mxu1 }
 0x129   : > { %v2318_v36 = vpop.f32.mrf.mxu1 }
 0x12b   : > { %v765_v37 = vpop.f32.mrf.mxu1 }
 0x12d   : > { %v2321_v38 = vpop.f32.mrf.mxu1 }
 0x12f   : > { %v775_v39 = vpop.f32.mrf.mxu1 }
 0x131   : > { %v2324_v40 = vpop.f32.mrf.mxu1 }
 0x133   : > { %v785_v41 = vpop.f32.mrf.mxu1 }
 0x135   : > { %v2327_v42 = vpop.f32.mrf.mxu1 }
 0x137   : > { %v795_v43 = vpop.f32.mrf.mxu1 }
 0x139   : > { %v2330_v44 = vpop.f32.mrf.mxu1 }
 0x13a   : > { %2331 = vmatprep.subr.mxu1 %v2330_v44 }
 0x13b   : > { %v805_v45 = vpop.f32.mrf.mxu1  ;;  %2332 = vmatpush3.msra.mxu1 %v2330_v44 }
 0x13c   : > { %2333 = vmatprep.subr.mxu1 %v805_v45 }
 0x13d   : > { %2334 = vmatpush3.msra.mxu1 %v805_v45 }
 0x13e   : > { %2335 = vmatprep.subr.mxu1 %v2327_v42 }
 0x13f   : > { %2336 = vmatpush3.msra.mxu1 %v2327_v42 }
 0x140   : > { %2337 = vmatprep.subr.mxu1 %v795_v43 }
 0x141   : > { %2338 = vmatpush3.msra.mxu1 %v795_v43 }
 0x142   : > { %2339 = vmatprep.subr.mxu1 %v2324_v40 }
 0x143   : > { %2340 = vmatpush3.msra.mxu1 %v2324_v40 }
 0x144   : > { %2341 = vmatprep.subr.mxu1 %v785_v41 }
 0x145   : > { %2342 = vmatpush3.msra.mxu1 %v785_v41 }
 0x146   : > { %2343 = vmatprep.subr.mxu1 %v2321_v38 }
 0x147   : > { %2344 = vmatpush3.msra.mxu1 %v2321_v38 }
 0x148   : > { %2345 = vmatprep.subr.mxu1 %v775_v39 }
 0x149   : > { %2346 = vmatpush3.msra.mxu1 %v775_v39 }
 0x14a   : > { %2347 = vmatprep.subr.mxu1 %v2318_v36 }
 0x14b   : > { %2348 = vmatpush3.msra.mxu1 %v2318_v36 }
 0x14c   : > { %2349 = vmatprep.subr.mxu1 %v765_v37 }
 0x14d   : > { %2350 = vmatpush3.msra.mxu1 %v765_v37 }
 0x14e   : > { %2351 = vmatprep.subr.mxu1 %v2315_v34 }
 0x14f   : > { %2352 = vmatpush3.msra.mxu1 %v2315_v34 }
 0x150   : > { %2353 = vmatprep.subr.mxu1 %v755_v35 }
 0x151   : > { %2354 = vmatpush3.msra.mxu1 %v755_v35 }
 0x152   : > { %2355 = vmatprep.subr.mxu1 %v2312_v32 }
 0x153   : > { %2356 = vmatpush3.msra.mxu1 %v2312_v32 }
 0x154   : > { %2357 = vmatprep.subr.mxu1 %v745_v33 }
 0x155   : > { %2358 = vmatpush3.msra.mxu1 %v745_v33 }
 0x156   : > { %2359 = vmatprep.subr.mxu1 %v2309_v30 }
 0x157   : > { %2360 = vmatpush3.msra.mxu1 %v2309_v30 }
 0x158   : > { %2361 = vmatprep.subr.mxu1 %v735_v31 }
 0x159   : > { %2362 = vmatpush3.msra.mxu1 %v735_v31 }
 0x15a   : > { %2364 = vmatmul.mubr.f32.vlgmr.msra.gmra.mxu1 %v3125_v46 }
 0x15b   : > { %2366 = vmatprep.mubr.f32.mxu1 %v3128_v47 }
 0x15e   : > { %2367 = vmatmul.mubr.f32.gmra.mxu1 %v3133_v48 }
 0x15f   : > { %2369 = vmatprep.mubr.f32.mxu1 %v3136_v49 }
 0x162   : > { %2370 = vmatmul.mubr.f32.gmra.mxu1 %v3141_v50 }
 0x163   : > { %2372 = vmatprep.mubr.f32.mxu1 %v3144_v51 }
 0x166   : > { %2373 = vmatmul.mubr.f32.gmra.mxu1 %v3149_v52 }
 0x167   : > { %2375 = vmatprep.mubr.f32.mxu1 %v3152_v53 }
 0x16a   : > { %2376 = vmatmul.mubr.f32.gmra.mxu1 %v3157_v54 }
 0x16b   : > { %2378 = vmatprep.mubr.f32.mxu1 %v3160_v55 }
 0x16e   : > { %2379 = vmatmul.mubr.f32.gmra.mxu1 %v3165_v56 }
 0x16f   : > { %2381 = vmatprep.mubr.f32.mxu1 %v3168_v57 }
 0x172   : > { %2382 = vmatmul.mubr.f32.gmra.mxu1 %v3173_v58 }
 0x173   : > { %2384 = vmatprep.mubr.f32.mxu1 %v3176_v59 }
 0x176   : > { %2385 = vmatmul.mubr.f32.gmra.mxu1 %v3181_v60 }
 0x177   : > { %2475 = vmatprep.mubr.f32.mxu1 %v3121_v17 }
 0x21a   : > { %v2365_v3 = vpop.f32.mrf.mxu1 }
 0x21b   : > { %v893_v4 = vadd.f32 %v2365_v3, %v2129_v2 }
 0x21c   : > { %v887_v5 = vpop.f32.mrf.mxu1 }
 0x21d   : > { %v888_v6 = vadd.f32 %v2129_v2, %v887_v5  ;;  %v967_v9 = vmax.f32 %v893_v4, 0.0  ;;  %v1295_v5 = vld [vmem:[%s586_s25] sm:$0xff]  ;;  %s571_s25 = sand.u32 1, %s2848_s21  }
 0x21e   : > { %v2368_v7 = vpop.f32.mrf.mxu1  ;;  %s572_s20 = scalar_lea.vmem [#allocation11], %s571_s25  ;;  %s1964_s28 = scalar_lea.sflag [#allocation5], %s571_s25 }
 0x21f   : > { %v966_v8 = vmax.f32 %v888_v6, 0.0  ;;  %v903_v10 = vadd.f32 %v2368_v7, %v2129_v2  ;;  %s1976_s30 = sshll.u32 %s572_s20, 4  ;;  %s1977_s30 = int_to_ptr.vmem [resolvable:$true] %s1976_s30 }
 0x220   : > { %v897_v11 = vpop.f32.mrf.mxu1  ;;  %s2784_s22 = scalar_lea.vmem %s1977_s30, 16  ;;  %p2791_p3 = scmp.lt.s32.totalorder %s1977_s30, %s2789_s19 }
 0x221   : > { %v898_v13 = vadd.f32 %v2129_v2, %v897_v11  ;;  %2419 = vmatprep.mubr.f32.mxu0 %v966_v8  ;;  %v969_v16 = vmax.f32 %v903_v10, 0.0  ;;  %p2785_p9 = scmp.ne.s32.totalorder %s1977_s30, %s2784_s22  ;;  %p2792_p4 = scmp.lt.s32.totalorder %s2790_s17, %s2784_s22 }
 0x222   : > { %v2371_v14 = vpop.f32.mrf.mxu1  ;;  %2420 = vmatmul.mubr.f32.vlgmr.msra.gmra.mxu0 %v967_v9 }
 0x223   : > { %v968_v15 = vmax.f32 %v898_v13, 0.0  ;;  %2500 = vmatpush3.msra.mxu0 %v1296_v12  ;;  %v913_v17 = vadd.f32 %v2371_v14, %v2129_v2  ;;  %p2786_p5 = pnand %p2785_p9, %p3458_p6  ;;  %p2793_p7 = por %p2792_p4, %p2791_p3 }
 0x224   : > { %v907_v18 = vpop.f32.mrf.mxu1 }
 0x225   : > { %v908_v19 = vadd.f32 %v2129_v2, %v907_v18  ;;  %2422 = vmatprep.mubr.f32.mxu0 %v968_v15  ;;  %v971_v22 = vmax.f32 %v913_v17, 0.0  ;;  %p2787_p1 = pneg %p2786_p5 }
 0x226   : > { %v2374_v20 = vpop.f32.mrf.mxu1  ;;  %2423 = vmatmul.mubr.f32.gmra.mxu0 %v969_v16 }
 0x227   : > { %v970_v21 = vmax.f32 %v908_v19, 0.0  ;;  %v923_v23 = vadd.f32 %v2374_v20, %v2129_v2  ;;  %p2794_p13 = pnand %p2793_p7, %p2787_p1 }
 0x228   : > { %v917_v24 = vpop.f32.mrf.mxu1 }
 0x229   : > { %v918_v25 = vadd.f32 %v2129_v2, %v917_v24  ;;  %2425 = vmatprep.mubr.f32.mxu0 %v970_v21  ;;  %v973_v28 = vmax.f32 %v923_v23, 0.0  ;;  %v1393_v23 = vld [vmem:[#allocation8 + $0x78] sm:$0xff]  ;;  %v1392_v24 = vld [vmem:[#allocation8 + $0x70] sm:$0xff] }
 0x22a   : > { %v2377_v26 = vpop.f32.mrf.mxu1  ;;  %2426 = vmatmul.mubr.f32.gmra.mxu0 %v971_v22 }
 0x22b   : > { %v972_v27 = vmax.f32 %v918_v25, 0.0  ;;  %v933_v29 = vadd.f32 %v2377_v26, %v2129_v2  ;;  %v1391_v25 = vld [vmem:[#allocation8 + $0x68] sm:$0xff]  ;;  %v1390_v26 = vld [vmem:[#allocation8 + $0x60] sm:$0xff] }
 0x22c   : > { %v927_v30 = vpop.f32.mrf.mxu1 }
 0x22d   : > { %v928_v31 = vadd.f32 %v2129_v2, %v927_v30  ;;  %2428 = vmatprep.mubr.f32.mxu0 %v972_v27  ;;  %v975_v34 = vmax.f32 %v933_v29, 0.0  ;;  %v1381_v27 = vld [vmem:[#allocation8 + $0x18] sm:$0xff]  ;;  %v1378_v29 = vld [vmem:[#allocation8] sm:$0xff]  ;;  %v1590_v30 = vld [vmem:[#allocation9 + $0x68] sm:$0xff] }
 0x22e   : > { %v2380_v32 = vpop.f32.mrf.mxu1  ;;  %2429 = vmatmul.mubr.f32.gmra.mxu0 %v973_v28 }
 0x22f   : > { %v974_v33 = vmax.f32 %v928_v31, 0.0  ;;  %v943_v35 = vadd.f32 %v2380_v32, %v2129_v2  ;;  %v1588_v31 = vld [vmem:[#allocation9 + $0x58] sm:$0xff]  ;;  %v1587_v32 = vld [vmem:[#allocation9 + $0x50] sm:$0xff] }
 0x230   : > { %v937_v36 = vpop.f32.mrf.mxu1 }
 0x231   : > { %v938_v37 = vadd.f32 %v2129_v2, %v937_v36  ;;  %2431 = vmatprep.mubr.f32.mxu0 %v974_v33  ;;  %v977_v40 = vmax.f32 %v943_v35, 0.0  ;;  %v1585_v33 = vld [vmem:[#allocation9 + $0x40] sm:$0xff]  ;;  %v1583_v35 = vld [vmem:[#allocation9 + $0x30] sm:$0xff]  ;;  %v1582_v36 = vld [vmem:[#allocation9 + $0x28] sm:$0xff] }
 0x232   : > { %v2383_v38 = vpop.f32.mrf.mxu1  ;;  %2432 = vmatmul.mubr.f32.gmra.mxu0 %v975_v34  ;;  %v1584_v34 = vld [vmem:[#allocation9 + $0x38] sm:$0xff] }
 0x233   : > { %v976_v39 = vmax.f32 %v938_v37, 0.0  ;;  %v953_v41 = vadd.f32 %v2383_v38, %v2129_v2  ;;  %v1581_v37 = vld [vmem:[#allocation9 + $0x20] sm:$0xff]  ;;  %v1580_v38 = vld [vmem:[#allocation9 + $0x18] sm:$0xff] }
 0x234   : > { %v947_v42 = vpop.f32.mrf.mxu1 }
 0x235   : > { %v948_v43 = vadd.f32 %v2129_v2, %v947_v42  ;;  %2434 = vmatprep.mubr.f32.mxu0 %v976_v39  ;;  %v979_v61 = vmax.f32 %v953_v41, 0.0  ;;  %v1579_v39 = vld [vmem:[#allocation9 + $0x10] sm:$0xff]  ;;  %v1577_v41 = vld [vmem:[#allocation9] sm:$0xff] }
 0x236   : > { %v2386_v44 = vpop.f32.mrf.mxu1  ;;  %2435 = vmatmul.mubr.f32.gmra.mxu0 %v977_v40  ;;  %v1578_v40 = vld [vmem:[#allocation9 + $0x8] sm:$0xff] }
 0x237   : > { %v978_v45 = vmax.f32 %v948_v43, 0.0  ;;  %v963_v62 = vadd.f32 %v2386_v44, %v2129_v2 }
 0x238   : > { %v957_v63 = vpop.f32.mrf.mxu1 }
 0x239   : > { %v958_v0 = vadd.f32 %v2129_v2, %v957_v63  ;;  %2437 = vmatprep.mubr.f32.mxu0 %v978_v45  ;;  %v981_v4 = vmax.f32 %v963_v62, 0.0 }
 0x23a   : > { %2438 = vmatmul.mubr.f32.gmra.mxu0 %v979_v61 }
 0x23b   : > { %v980_v3 = vmax.f32 %v958_v0, 0.0 }
 0x23d   : > { %2440 = vmatprep.mubr.f32.mxu0 %v980_v3 }
 0x23e   : > { %2441 = vmatmul.mubr.f32.gmra.mxu0 %v981_v4 }
 0x23f   : > { %2501 = vmatprep.mubr.msk.f32.mxu0 %vm2865_vm1, %v2864_v1 }
 0x242   : > { %2502 = vmatmul.mubr.msk.f32.vlgmr.msra.gmra.mxu0 %vm620_vm0, %v1295_v5  ;;  %vm1959_vm0 = vcmask 1048512  }
 0x2e2   : > { %v2421_v6 = vpop.f32.mrf.mxu0 }
 0x2e4   : > { %v1064_v2 = vpop.f32.mrf.mxu0 }
 0x2e6   : > { %v2424_v7 = vpop.f32.mrf.mxu0 }
 0x2e8   : > { %v1074_v8 = vpop.f32.mrf.mxu0 }
 0x2ea   : > { %v2427_v9 = vpop.f32.mrf.mxu0 }
 0x2ec   : > { %v1084_v10 = vpop.f32.mrf.mxu0 }
 0x2ee   : > { %v2430_v11 = vpop.f32.mrf.mxu0 }
 0x2f0   : > { %v1094_v12 = vpop.f32.mrf.mxu0 }
 0x2f2   : > { %v2433_v13 = vpop.f32.mrf.mxu0 }
 0x2f4   : > { %v1104_v14 = vpop.f32.mrf.mxu0 }
 0x2f6   : > { %v2436_v15 = vpop.f32.mrf.mxu0 }
 0x2f8   : > { %v1114_v16 = vpop.f32.mrf.mxu0 }
 0x2fa   : > { %v2439_v17 = vpop.f32.mrf.mxu0 }
 0x2fc   : > { %v1124_v18 = vpop.f32.mrf.mxu0 }
 0x2fe   : > { %v2442_v19 = vpop.f32.mrf.mxu0 }
 0x2ff   : > { %2443 = vmatprep.subr.mxu1 %v2442_v19 }
 0x300   : > { %v1134_v20 = vpop.f32.mrf.mxu0  ;;  %2444 = vmatpush3.msra.mxu1 %v2442_v19 }
 0x301   : > { %2445 = vmatprep.subr.mxu1 %v1134_v20 }
 0x302   : > { %2446 = vmatpush3.msra.mxu1 %v1134_v20  ;;  %v3199_v21 = vpop.f32.mrf.mxu0 }
 0x303   : > { %2447 = vmatprep.subr.mxu1 %v2439_v17 }
 0x304   : > { %2448 = vmatpush3.msra.mxu1 %v2439_v17  ;;  %v2503_v22 = vpop.f32.mrf.mxu0 }
 0x305   : > { %2449 = vmatprep.subr.mxu1 %v1124_v18 }
 0x306   : > { %2450 = vmatpush3.msra.mxu1 %v1124_v18 }
 0x307   : > { %2451 = vmatprep.subr.mxu1 %v2436_v15 }
 0x308   : > { %2452 = vmatpush3.msra.mxu1 %v2436_v15  ;;  %v2133_v15 = vld [vmem:[%s3430_s10] ss:$0 sm:$0xff] }
 0x309   : > { %2453 = vmatprep.subr.mxu1 %v1114_v16 }
 0x30a   : > { %2454 = vmatpush3.msra.mxu1 %v1114_v16 }
 0x30b   : > { %2455 = vmatprep.subr.mxu1 %v2433_v13 }
 0x30c   : > { %2456 = vmatpush3.msra.mxu1 %v2433_v13 }
 0x30d   : > { %2457 = vmatprep.subr.mxu1 %v1104_v14 }
 0x30e   : > { %2458 = vmatpush3.msra.mxu1 %v1104_v14 }
 0x30f   : > { %2459 = vmatprep.subr.mxu1 %v2430_v11 }
 0x310   : > { %2460 = vmatpush3.msra.mxu1 %v2430_v11 }
 0x311   : > { %2461 = vmatprep.subr.mxu1 %v1094_v12 }
 0x312   : > { %2462 = vmatpush3.msra.mxu1 %v1094_v12 }
 0x313   : > { %2463 = vmatprep.subr.mxu1 %v2427_v9 }
 0x314   : > { %2464 = vmatpush3.msra.mxu1 %v2427_v9 }
 0x315   : > { %2465 = vmatprep.subr.mxu1 %v1084_v10 }
 0x316   : > { %2466 = vmatpush3.msra.mxu1 %v1084_v10 }
 0x317   : > { %2467 = vmatprep.subr.mxu1 %v2424_v7 }
 0x318   : > { %2468 = vmatpush3.msra.mxu1 %v2424_v7 }
 0x319   : > { %2469 = vmatprep.subr.mxu1 %v1074_v8 }
 0x31a   : > { %2470 = vmatpush3.msra.mxu1 %v1074_v8  ;;  %v1476_v8 = vlaneseq }
 0x31b   : > { %2471 = vmatprep.subr.mxu1 %v2421_v6 }
 0x31c   : > { %2472 = vmatpush3.msra.mxu1 %v2421_v6  ;;  %v3247_v12 = vshrl.u32 %v1476_v8, 7 }
 0x31d   : > { %2473 = vmatprep.subr.mxu1 %v1064_v2 }
 0x31e   : > { %2474 = vmatpush3.msra.mxu1 %v1064_v2  ;;  %v2866_v2 = vmov 1966171168   ;;  %v1523_v22 = vsub.s32 0, %v3247_v12 }
 0x31f   : > { %2476 = vmatmul.mubr.f32.vlgmr.msra.gmra.mxu1 %v3125_v46  ;;  %2504 = vmatprep.subr.mxu1 %v2864_v1  ;;  %v1389_v46 = vld [vmem:[#allocation8 + $0x58] sm:$0xff]  ;;  %v1474_v7 = vunpack.c.l.s4 %v2866_v2 }
 0x320   : > { %2505 = vmatpush3.msra.mxu1 %v1393_v23  ;;  %2478 = vmatprep.mubr.f32.mxu1 %v3128_v47  ;;  %v1388_v47 = vld [vmem:[#allocation8 + $0x50] sm:$0xff] }
 0x321   : > { %2506 = vmatprep.subr.mxu1 %v2864_v1  ;;  %v1475_v11 = vunpack.c.0.s8 %v1474_v7 }
 0x322   : > { %2507 = vmatpush3.msra.mxu1 %v1392_v24 }
 0x323   : > { %2479 = vmatmul.mubr.f32.gmra.mxu1 %v3133_v48  ;;  %2508 = vmatprep.subr.mxu1 %v2864_v1  ;;  %v1387_v48 = vld [vmem:[#allocation8 + $0x48] sm:$0xff]  ;;  %v1478_v16 = vsub.s32 %v1475_v11, %v3247_v12 }
 0x324   : > { %2509 = vmatpush3.msra.mxu1 %v1391_v25  ;;  %2481 = vmatprep.mubr.f32.mxu1 %v3136_v49  ;;  %v1386_v49 = vld [vmem:[#allocation8 + $0x40] sm:$0xff] }
 0x325   : > { %2510 = vmatprep.subr.mxu1 %v2864_v1 }
 0x326   : > { %2511 = vmatpush3.msra.mxu1 %v1390_v26 }
 0x327   : > { %2482 = vmatmul.mubr.f32.gmra.mxu1 %v3141_v50  ;;  %2512 = vmatprep.subr.mxu1 %v2864_v1  ;;  %v1385_v50 = vld [vmem:[#allocation8 + $0x38] sm:$0xff] }
 0x328   : > { %2513 = vmatpush3.msra.mxu1 %v1389_v46  ;;  %2484 = vmatprep.mubr.f32.mxu1 %v3144_v51  ;;  %v1384_v51 = vld [vmem:[#allocation8 + $0x30] sm:$0xff] }
 0x329   : > { %2514 = vmatprep.subr.mxu1 %v2864_v1 }
 0x32a   : > { %2515 = vmatpush3.msra.mxu1 %v1388_v47 }
 0x32b   : > { %2485 = vmatmul.mubr.f32.gmra.mxu1 %v3149_v52  ;;  %2516 = vmatprep.subr.mxu1 %v2864_v1  ;;  %v1383_v52 = vld [vmem:[#allocation8 + $0x28] sm:$0xff] }
 0x32c   : > { %2517 = vmatpush3.msra.mxu1 %v1387_v48  ;;  %2487 = vmatprep.mubr.f32.mxu1 %v3152_v53  ;;  %v1382_v53 = vld [vmem:[#allocation8 + $0x20] sm:$0xff] }
 0x32d   : > { %2518 = vmatprep.subr.mxu1 %v2864_v1 }
 0x32e   : > { %2519 = vmatpush3.msra.mxu1 %v1386_v49 }
 0x32f   : > { %2488 = vmatmul.mubr.f32.gmra.mxu1 %v3157_v54  ;;  %2520 = vmatprep.subr.mxu1 %v2864_v1  ;;  %v2131_v54 = vld [vmem:[%s3428_s8] ss:$0 sm:$0xff] }
 0x330   : > { %2521 = vmatpush3.msra.mxu1 %v1385_v50  ;;  %2490 = vmatprep.mubr.f32.mxu1 %v3160_v55  ;;  %v1374_v55 = vadd.f32 %v2131_v54, %v3199_v21  ;;  %v3260_v21 = vld [vmem:[%s3426_s6] ss:$0 sm:$0xff] }
 0x331   : > { %2522 = vmatprep.subr.mxu1 %v2864_v1 }
 0x332   : > { %2523 = vmatpush3.msra.mxu1 %v1384_v51  ;;  %v1377_v28 = vmax.f32 %v1374_v55, 0.0 }
 0x333   : > { %2491 = vmatmul.mubr.f32.gmra.mxu1 %v3165_v56  ;;  %2524 = vmatprep.subr.mxu1 %v2864_v1  ;;  %v1380_v56 = vld [vmem:[#allocation8 + $0x10] sm:$0xff] }
 0x334   : > { %2525 = vmatpush3.msra.mxu1 %v1383_v52  ;;  %2493 = vmatprep.mubr.f32.mxu1 %v3168_v57  ;;  %v1379_v57 = vld [vmem:[#allocation8 + $0x8] sm:$0xff] }
 0x335   : > { %2526 = vmatprep.subr.mxu1 %v2864_v1 }
 0x336   : > { %2527 = vmatpush3.msra.mxu1 %v1382_v53 }
 0x337   : > { %2494 = vmatmul.mubr.f32.gmra.mxu1 %v3173_v58  ;;  %2528 = vmatprep.subr.mxu1 %v2864_v1  ;;  %v1592_v58 = vld [vmem:[#allocation9 + $0x78] sm:$0xff] }
 0x338   : > { %2529 = vmatpush3.msra.mxu1 %v1381_v27  ;;  %2496 = vmatprep.mubr.f32.mxu1 %v3176_v59  ;;  %v1591_v59 = vld [vmem:[#allocation9 + $0x70] sm:$0xff] }
 0x339   : > { %2530 = vmatprep.subr.mxu1 %v2864_v1  ;;  %2539 = vmatprep.subr.mxu0 %v1592_v58 }
 0x33a   : > { %2531 = vmatpush3.msra.mxu1 %v1380_v56  ;;  %2540 = vmatpush3.msra.mxu0 %v1592_v58 }
 0x33b   : > { %2497 = vmatmul.mubr.f32.gmra.mxu1 %v3181_v60  ;;  %2532 = vmatprep.subr.mxu1 %v2864_v1  ;;  %v1589_v60 = vld [vmem:[#allocation9 + $0x60] sm:$0xff] }
 0x33c   : > { %2533 = vmatpush3.msra.mxu1 %v1379_v57  ;;  %2536 = vmatprep.mubr.msk.f32.mxu1 %vm2865_vm1, %v2864_v1 }
 0x33d   : > { %2534 = vmatprep.subr.mxu1 %v2864_v1  ;;  %2541 = vmatprep.subr.mxu0 %v1591_v59  ;;  %v1586_v1 = vld [vmem:[#allocation9 + $0x48] sm:$0xff] }
 0x33e   : > { %2535 = vmatpush3.msra.mxu1 %v1378_v29  ;;  %2542 = vmatpush3.msra.mxu0 %v1591_v59 }
 0x33f   : > { %2537 = vmatmul.mubr.f32.vlgmr.msra.gmra.mxu1 %v1377_v28  ;;  %2543 = vmatprep.subr.mxu0 %v1590_v30 }
 0x340   : > { %2544 = vmatpush3.msra.mxu0 %v1590_v30 }
 0x341   : > { %2545 = vmatprep.subr.mxu0 %v1589_v60 }
 0x342   : > { %2546 = vmatpush3.msra.mxu0 %v1589_v60 }
 0x343   : > { %2547 = vmatprep.subr.mxu0 %v1588_v31 }
 0x344   : > { %2548 = vmatpush3.msra.mxu0 %v1588_v31 }
 0x345   : > { %2549 = vmatprep.subr.mxu0 %v1587_v32 }
 0x346   : > { %2550 = vmatpush3.msra.mxu0 %v1587_v32 }
 0x347   : > { %2551 = vmatprep.subr.mxu0 %v1586_v1 }
 0x348   : > { %2552 = vmatpush3.msra.mxu0 %v1586_v1 }
 0x349   : > { %2553 = vmatprep.subr.mxu0 %v1585_v33 }
 0x34a   : > { %2554 = vmatpush3.msra.mxu0 %v1585_v33 }
 0x34b   : > { %2555 = vmatprep.subr.mxu0 %v1584_v34 }
 0x34c   : > { %2556 = vmatpush3.msra.mxu0 %v1584_v34 }
 0x34d   : > { %2557 = vmatprep.subr.mxu0 %v1583_v35 }
 0x34e   : > { %2558 = vmatpush3.msra.mxu0 %v1583_v35 }
 0x34f   : > { %2559 = vmatprep.subr.mxu0 %v1582_v36 }
 0x350   : > { %2560 = vmatpush3.msra.mxu0 %v1582_v36 }
 0x351   : > { %2561 = vmatprep.subr.mxu0 %v1581_v37 }
 0x352   : > { %2562 = vmatpush3.msra.mxu0 %v1581_v37 }
 0x353   : > { %2563 = vmatprep.subr.mxu0 %v1580_v38 }
 0x354   : > { %2564 = vmatpush3.msra.mxu0 %v1580_v38 }
 0x355   : > { %2565 = vmatprep.subr.mxu0 %v1579_v39 }
 0x356   : > { %2566 = vmatpush3.msra.mxu0 %v1579_v39 }
 0x357   : > { %2567 = vmatprep.subr.mxu0 %v1578_v40 }
 0x358   : > { %2568 = vmatpush3.msra.mxu0 %v1578_v40 }
 0x359   : > { %2569 = vmatprep.subr.mxu0 %v1577_v41 }
 0x35a   : > { %2570 = vmatpush3.msra.mxu0 %v1577_v41 }
 0x3df   : > { %v2477_v42 = vpop.f32.mrf.mxu1 }
 0x3e0   : > { %v1222_v25 = vadd.f32 %v2477_v42, %v3260_v21 }
 0x3e1   : > { %v1216_v43 = vpop.f32.mrf.mxu1 }
 0x3e2   : > { %v1217_v46 = vadd.f32 %v3260_v21, %v1216_v43 }
 0x3e3   : > { %v2480_v44 = vpop.f32.mrf.mxu1 }
 0x3e4   : > { %v1232_v57 = vadd.f32 %v2480_v44, %v3260_v21 }
 0x3e5   : > { %v1226_v45 = vpop.f32.mrf.mxu1 }
 0x3e6   : > { %v1227_v50 = vadd.f32 %v3260_v21, %v1226_v45 }
 0x3e7   : > { %v2483_v61 = vpop.f32.mrf.mxu1 }
 0x3e8   : > { %v1242_v31 = vadd.f32 %v2483_v61, %v3260_v21 }
 0x3e9   : > { %v1236_v62 = vpop.f32.mrf.mxu1 }
 0x3ea   : > { %v1237_v28 = vadd.f32 %v3260_v21, %v1236_v62 }
 0x3eb   : > { %v2486_v63 = vpop.f32.mrf.mxu1 }
 0x3ec   : > { %v1252_v36 = vadd.f32 %v2486_v63, %v3260_v21 }
 0x3ed   : > { %v1246_v0 = vpop.f32.mrf.mxu1 }
 0x3ee   : > { %v1247_v32 = vadd.f32 %v3260_v21, %v1246_v0 }
 0x3ef   : > { %v3238_v3 = vpop.f32.mrf.mxu1 }
 0x3f0   : > { %v1262_v42 = vadd.f32 %v3238_v3, %v3260_v21 }
 0x3f1   : > { %v1256_v4 = vpop.f32.mrf.mxu1 }
 0x3f2   : > { %v1257_v37 = vadd.f32 %v3260_v21, %v1256_v4 }
 0x3f3   : > { %v3240_v5 = vpop.f32.mrf.mxu1 }
 0x3f4   : > { %v1272_v63 = vadd.f32 %v3240_v5, %v3260_v21 }
 0x3f5   : > { %v1266_v6 = vpop.f32.mrf.mxu1 }
 0x3f6   : > { %v1267_v43 = vadd.f32 %v3260_v21, %v1266_v6 }
 0x3f7   : > { %v3242_v9 = vpop.f32.mrf.mxu1 }
 0x3f8   : > { %v1282_v3 = vadd.f32 %v3242_v9, %v3260_v21 }
 0x3f9   : > { %v3244_v10 = vpop.f32.mrf.mxu1 }
 0x3fa   : > { %v1277_v0 = vadd.f32 %v3260_v21, %v3244_v10 }
 0x3fb   : > { %v3249_v13 = vpop.f32.mrf.mxu1 }
 0x3fc   : > { %v1292_v5 = vadd.f32 %v3249_v13, %v3260_v21 }
 0x3fd   : > { %v3251_v14 = vpop.f32.mrf.mxu1 }
 0x3fe   : > { %v1287_v6 = vadd.f32 %v3260_v21, %v3251_v14  ;;  %v3294_v14 = vld [vmem:[%s3433_s13] ss:$0 sm:$0xff] }
 0x3ff   : > { %v1467_v17 = vpop.f32.mrf.mxu1 }
 0x400   : > { %v1468_v18 = vadd.f32 %v2133_v15, %v1467_v17 }
 0x401   : > { %v2538_v19 = vpop.f32.mrf.mxu1 }
 0x402   : > { %v1479_v20 = vrot.slane %v1468_v18, %v1478_v16  ;;  %v1472_v47 = vcombine.high %v1468_v18, %v1468_v18 }
 0x404   : > { %v1487_v23 = vcombine.high %v1479_v20, %v1479_v20  ;;  %v1495_v24 = vrot.slane %v1479_v20, %v1478_v16  ;;  %v1486_v27 = vrot.slane %v1472_v47, %v1478_v16 }
 0x406   : > { %v1509_v26 = vrot.slane %v1487_v23, %v1478_v16  ;;  %v1517_v48 = vcombine.high %v1495_v24, %v1495_v24  ;;  %v1524_v49 = vrot.slane %v1495_v24, %v1523_v22  ;;  %v1488_v58 = vcombine.high %v1486_v27, %v1486_v27 }
 0x407   : > { %v1502_v59 = vrot.slane %v1486_v27, %v1478_v16 }
 0x408   : > { %v1528_v51 = vrot.slane %v1509_v26, %v1523_v22  ;;  %v1561_v52 = vadd.f32 %v1524_v49, %v1217_v46  ;;  %v1562_v53 = vadd.f32 %v1524_v49, %v1222_v25  ;;  %v1532_v55 = vrot.slane %v1517_v48, %v1523_v22 }
 0x409   : > { %v1519_v56 = vcombine.high %v1509_v26, %v1509_v26  ;;  %v1540_v34 = vrot.slane %v1502_v59, %v1523_v22  ;;  %v1516_v35 = vrot.slane %v1488_v58, %v1478_v16  ;;  %v1518_v41 = vcombine.high %v1502_v59, %v1502_v59  ;;  %v3288_v16 = vld [vmem:[%s3432_s12] ss:$0 sm:$0xff] }
 0x40a   : > { %v1563_v54 = vadd.f32 %v1528_v51, %v1227_v50  ;;  %2571 = vmatprep.mubr.f32.mxu0 %v1561_v52  ;;  %v1564_v29 = vadd.f32 %v1528_v51, %v1232_v57  ;;  %v1565_v30 = vadd.f32 %v1532_v55, %v1237_v28  ;;  %v1566_v1 = vadd.f32 %v1532_v55, %v1242_v31 }
 0x40b   : > { %2572 = vmatmul.mubr.f32.vlgmr.msra.gmra.mxu0 %v1562_v53  ;;  %v1536_v60 = vrot.slane %v1519_v56, %v1523_v22  ;;  %v1569_v39 = vadd.f32 %v1540_v34, %v1257_v37  ;;  %v1544_v40 = vrot.slane %v1516_v35, %v1523_v22  ;;  %v1570_v44 = vadd.f32 %v1540_v34, %v1262_v42 }
 0x40c   : > { %2574 = vmatprep.mubr.f32.mxu0 %v1563_v54  ;;  %v1548_v61 = vrot.slane %v1518_v41, %v1523_v22  ;;  %v1520_v62 = vcombine.high %v1516_v35, %v1516_v35 }
 0x40d   : > { %v1567_v33 = vadd.f32 %v1536_v60, %v1247_v32  ;;  %v1568_v38 = vadd.f32 %v1536_v60, %v1252_v36  ;;  %v1571_v45 = vadd.f32 %v1544_v40, %v1267_v43  ;;  %v1572_v4 = vadd.f32 %v1544_v40, %v1272_v63 }
 0x40e   : > { %v1573_v2 = vadd.f32 %v1548_v61, %v1277_v0  ;;  %v1552_v7 = vrot.slane %v1520_v62, %v1523_v22  ;;  %v1574_v11 = vadd.f32 %v1548_v61, %v1282_v3 }
 0x40f   : > { %2575 = vmatmul.mubr.f32.gmra.mxu0 %v1564_v29 }
 0x410   : > { %2577 = vmatprep.mubr.f32.mxu0 %v1565_v30  ;;  %v1575_v15 = vadd.f32 %v1552_v7, %v1287_v6  ;;  %v1576_v10 = vadd.f32 %v1552_v7, %v1292_v5 }
 0x413   : > { %2578 = vmatmul.mubr.f32.gmra.mxu0 %v1566_v1 }
 0x414   : > { %2580 = vmatprep.mubr.f32.mxu0 %v1567_v33 }
 0x417   : > { %2581 = vmatmul.mubr.f32.gmra.mxu0 %v1568_v38 }
 0x418   : > { %2583 = vmatprep.mubr.f32.mxu0 %v1569_v39 }
 0x41b   : > { %2584 = vmatmul.mubr.f32.gmra.mxu0 %v1570_v44 }
 0x41c   : > { %2586 = vmatprep.mubr.f32.mxu0 %v1571_v45 }
 0x41f   : > { %2587 = vmatmul.mubr.f32.gmra.mxu0 %v1572_v4 }
 0x420   : > { %2589 = vmatprep.mubr.f32.mxu0 %v1573_v2 }
 0x423   : > { %2590 = vmatmul.mubr.f32.gmra.mxu0 %v1574_v11 }
 0x424   : > { %2592 = vmatprep.mubr.f32.mxu0 %v1575_v15 }
 0x427   : > { %2593 = vmatmul.mubr.f32.gmra.mxu0 %v1576_v10 }
 0x4cb   : > { %v2573_v9 = vpop.f32.mrf.mxu0 }
 0x4cc   : > { %v1672_v17 = vadd.f32 %v2573_v9, %v3288_v16 }
 0x4cd   : > { %v1666_v18 = vpop.f32.mrf.mxu0 }
 0x4ce   : > { %v1746_v19 = vmax.f32 %v1672_v17, 0.0  ;;  %v1667_v13 = vadd.f32 %v3288_v16, %v1666_v18 }
 0x4cf   : > { %v2576_v20 = vpop.f32.mrf.mxu0 }
 0x4d0   : > { %v1745_v21 = vmax.f32 %v1667_v13, 0.0  ;;  %v1682_v22 = vadd.f32 %v2576_v20, %v3288_v16  ;;  %v1769_v23 = vmul.f32 %v3294_v14, %v1746_v19  ;;  %v3328_v13 = vand.u32 127, %v1476_v8 }
 0x4d1   : > { %v1676_v24 = vpop.f32.mrf.mxu0 }
 0x4d2   : > { %v1748_v25 = vmax.f32 %v1682_v22, 0.0  ;;  %v1677_v26 = vadd.f32 %v3288_v16, %v1676_v24  ;;  %1786 = vadd.xlane.f32.xlu0 %v1769_v23  ;;  %v1768_v50 = vmul.f32 %v3294_v14, %v1745_v21  ;;  %v1856_v20 = vadd.s32 4294967288, %v3328_v13 }
 0x4d3   : > { %v2579_v46 = vpop.f32.mrf.mxu0  ;;  %v3331_v21 = vstv %s1816_s24  ;;  %v1863_v22 = vadd.s32 4294967280, %v3328_v13  ;;  %v1870_v23 = vadd.s32 4294967272, %v3328_v13 }
 0x4d4   : > { %v1747_v47 = vmax.f32 %v1677_v26, 0.0  ;;  %v1692_v48 = vadd.f32 %v2579_v46, %v3288_v16  ;;  %v1771_v49 = vmul.f32 %v3294_v14, %v1748_v25  ;;  %v1854_v25 = vsub.s32 %v3328_v13, %v3247_v12 }
 0x4d5   : > { %v1686_v51 = vpop.f32.mrf.mxu0  ;;  %v1877_v46 = vadd.s32 4294967264, %v3328_v13  ;;  %v1859_v8 = vsub.s32 %v1856_v20, %v3247_v12 }
 0x4d6   : > { %v1687_v52 = vadd.f32 %v3288_v16, %v1686_v51  ;;  %1790 = vadd.xlane.f32.xlu1 %v1771_v49  ;;  %1784 = vadd.xlane.f32.xlu0 %v1768_v50  ;;  %v1750_v54 = vmax.f32 %v1692_v48, 0.0  ;;  %v1770_v56 = vmul.f32 %v3294_v14, %v1747_v47  ;;  %v1866_v48 = vsub.s32 %v1863_v22, %v3247_v12 }
 0x4d7   : > { %v2582_v53 = vpop.f32.mrf.mxu0  ;;  %v1884_v49 = vadd.s32 4294967256, %v3328_v13  ;;  %v1873_v50 = vsub.s32 %v1870_v23, %v3247_v12 }
 0x4d8   : > { %v1749_v27 = vmax.f32 %v1687_v52, 0.0  ;;  %v1702_v55 = vadd.f32 %v2582_v53, %v3288_v16  ;;  %v1773_v31 = vmul.f32 %v3294_v14, %v1750_v54 }
 0x4d9   : > { %v1696_v57 = vpop.f32.mrf.mxu0 }
 0x4da   : > { %v1697_v28 = vadd.f32 %v3288_v16, %v1696_v57  ;;  %1788 = vadd.xlane.f32.xlu1 %v1770_v56  ;;  %v1772_v29 = vmul.f32 %v3294_v14, %v1749_v27  ;;  %v1752_v59 = vmax.f32 %v1702_v55, 0.0  ;;  %v1880_v27 = vsub.s32 %v1877_v46, %v3247_v12 }
 0x4db   : > { %v2585_v58 = vpop.f32.mrf.mxu0  ;;  %v1891_v55 = vadd.s32 4294967248, %v3328_v13 }
 0x4dc   : > { %v1751_v30 = vmax.f32 %v1697_v28, 0.0  ;;  %v1712_v60 = vadd.f32 %v2585_v58, %v3288_v16  ;;  %1792 = vadd.xlane.f32.xlu0 %v1772_v29  ;;  %v1775_v38 = vmul.f32 %v3294_v14, %v1752_v59  ;;  %v1887_v58 = vsub.s32 %v1884_v49, %v3247_v12 }
 0x4dd   : > { %v1706_v32 = vpop.f32.mrf.mxu0  ;;  %v1898_v59 = vadd.s32 4294967240, %v3328_v13 }
 0x4de   : > { %v1707_v1 = vadd.f32 %v3288_v16, %v1706_v32  ;;  %1794 = vadd.xlane.f32.xlu1 %v1773_v31  ;;  %v1774_v33 = vmul.f32 %v3294_v14, %v1751_v30  ;;  %v1754_v35 = vmax.f32 %v1712_v60, 0.0  ;;  %v1905_v32 = vadd.s32 4294967232, %v3328_v13 }
 0x4df   : > { %v2588_v34 = vpop.f32.mrf.mxu0 }
 0x4e0   : > { %v1753_v36 = vmax.f32 %v1707_v1, 0.0  ;;  %v1722_v37 = vadd.f32 %v2588_v34, %v3288_v16  ;;  %1796 = vadd.xlane.f32.xlu0 %v1774_v33  ;;  %v1777_v61 = vmul.f32 %v3294_v14, %v1754_v35  ;;  %v1894_v35 = vsub.s32 %v1891_v55, %v3247_v12 }
 0x4e1   : > { %v1716_v39 = vpop.f32.mrf.mxu0 }
 0x4e2   : > { %v1717_v40 = vadd.f32 %v3288_v16, %v1716_v39  ;;  %1798 = vadd.xlane.f32.xlu1 %v1775_v38  ;;  %v1776_v41 = vmul.f32 %v3294_v14, %v1753_v36  ;;  %v1756_v43 = vmax.f32 %v1722_v37, 0.0  ;;  %v1912_v38 = vadd.s32 4294967224, %v3328_v13 }
 0x4e3   : > { %v2591_v42 = vpop.f32.mrf.mxu0 }
 0x4e4   : > { %v1755_v44 = vmax.f32 %v1717_v40, 0.0  ;;  %v1732_v45 = vadd.f32 %v2591_v42, %v3288_v16  ;;  %1800 = vadd.xlane.f32.xlu0 %v1776_v41  ;;  %v1779_v6 = vmul.f32 %v3294_v14, %v1756_v43  ;;  %v1901_v42 = vsub.s32 %v1898_v59, %v3247_v12 }
 0x4e5   : > { %v1726_v62 = vpop.f32.mrf.mxu0 }
 0x4e6   : > { %v1727_v63 = vadd.f32 %v3288_v16, %v1726_v62  ;;  %1802 = vadd.xlane.f32.xlu1 %v1777_v61  ;;  %v1778_v0 = vmul.f32 %v3294_v14, %v1755_v44  ;;  %v1758_v2 = vmax.f32 %v1732_v45, 0.0  ;;  %v1908_v44 = vsub.s32 %v1905_v32, %v3247_v12 }
 0x4e7   : > { %v2594_v4 = vpop.f32.mrf.mxu0 }
 0x4e8   : > { %v1757_v7 = vmax.f32 %v1727_v63, 0.0  ;;  %v1742_v3 = vadd.f32 %v2594_v4, %v3288_v16  ;;  %1804 = vadd.xlane.f32.xlu0 %v1778_v0  ;;  %v1781_v17 = vmul.f32 %v3294_v14, %v1758_v2  ;;  %v1919_v63 = vadd.s32 4294967216, %v3328_v13 }
 0x4e9   : > { %v1736_v11 = vpop.f32.mrf.mxu0  ;;  %v1915_v4 = vsub.s32 %v1912_v38, %v3247_v12 }
 0x4ea   : > { %v1737_v15 = vadd.f32 %v3288_v16, %v1736_v11  ;;  %1806 = vadd.xlane.f32.xlu1 %v1779_v6  ;;  %v1780_v5 = vmul.f32 %v3294_v14, %v1757_v7  ;;  %v1760_v10 = vmax.f32 %v1742_v3, 0.0  ;;  %v1926_v6 = vadd.s32 4294967208, %v3328_v13 }
 0x4ec   : > { %v1759_v9 = vmax.f32 %v1737_v15, 0.0  ;;  %1808 = vadd.xlane.f32.xlu0 %v1780_v5  ;;  %v1783_v19 = vmul.f32 %v3294_v14, %v1760_v10  ;;  %v1933_v15 = vadd.s32 4294967200, %v3328_v13  ;;  %v1929_v23 = vsub.s32 %v1926_v6, %v3247_v12 }
 0x4ee   : > { %1810 = vadd.xlane.f32.xlu1 %v1781_v17  ;;  %v1782_v18 = vmul.f32 %v3294_v14, %v1759_v9  ;;  %v1922_v17 = vsub.s32 %v1919_v63, %v3247_v12 }
 0x4f0   : > { %1812 = vadd.xlane.f32.xlu0 %v1782_v18 }
 0x4f2   : > { %1814 = vadd.xlane.f32.xlu1 %v1783_v19  ;;  %v1940_v19 = vadd.s32 4294967192, %v3328_v13 }
 0x55b   : > { %v1787_v16 = vpop.xlane.xlu0 %1786 }
 0x55c   : > { %v1819_v47 = vadd.f32 %v3331_v21, %v1787_v16 }
 0x55e   : > { %v1860_v56 = vrot.slane %v1819_v47, %v1859_v8  ;;  %v1947_v8 = vadd.s32 4294967184, %v3328_v13 }
 0x55f   : > { %v1791_v24 = vpop.xlane.xlu1 %1790  ;;  %v1785_v26 = vpop.xlane.xlu0 %1784 }
 0x560   : > { %v1818_v14 = vadd.f32 %v3331_v21, %v1785_v26  ;;  %v1821_v51 = vadd.f32 %v3331_v21, %v1791_v24 }
 0x562   : > { %v1855_v52 = vrot.slane %v1818_v14, %v1854_v25  ;;  %v1874_v30 = vrot.slane %v1821_v51, %v1873_v50  ;;  %v1936_v25 = vsub.s32 %v1933_v15, %v3247_v12 }
 0x563   : > { %v1789_v53 = vpop.xlane.xlu1 %1788 }
 0x564   : > { %v1820_v54 = vadd.f32 %v3331_v21, %v1789_v53  ;;  %v1862_v60 = vsel %vm1861_vm2, %v1860_v56, %v1855_v52  ;;  %v1954_v52 = vadd.s32 4294967176, %v3328_v13  ;;  %v1950_v56 = vsub.s32 %v1947_v8, %v3247_v12 }
 0x565   : > { %v1793_v57 = vpop.xlane.xlu0 %1792 }
 0x566   : > { %v1867_v28 = vrot.slane %v1820_v54, %v1866_v48  ;;  %v1822_v29 = vadd.f32 %v3331_v21, %v1793_v57  ;;  %v1943_v48 = vsub.s32 %v1940_v19, %v3247_v12  ;;  %v1957_v59 = vsub.s32 %v1954_v52, %v3247_v12 }
 0x567   : > { %v1795_v31 = vpop.xlane.xlu1 %1794 }
 0x568   : > { %v1869_v1 = vsel %vm1868_vm3, %v1867_v28, %v1862_v60  ;;  %v1881_v33 = vrot.slane %v1822_v29, %v1880_v27  ;;  %v1823_v34 = vadd.f32 %v3331_v21, %v1795_v31 }
 0x569   : > { %v1876_v36 = vsel %vm1875_vm4, %v1874_v30, %v1869_v1  ;;  %v1797_v37 = vpop.xlane.xlu0 %1796 }
 0x56a   : > { %v1883_v39 = vsel %vm1882_vm5, %v1881_v33, %v1876_v36  ;;  %v1888_v40 = vrot.slane %v1823_v34, %v1887_v58  ;;  %v1824_v41 = vadd.f32 %v3331_v21, %v1797_v37 }
 0x56b   : > { %v1799_v43 = vpop.xlane.xlu1 %1798 }
 0x56c   : > { %v1890_v45 = vsel %vm1889_vm6, %v1888_v40, %v1883_v39  ;;  %v1895_v61 = vrot.slane %v1824_v41, %v1894_v35  ;;  %v1825_v62 = vadd.f32 %v3331_v21, %v1799_v43 }
 0x56d   : > { %v1801_v0 = vpop.xlane.xlu0 %1800 }
 0x56e   : > { %v1897_v2 = vsel %vm1896_vm7, %v1895_v61, %v1890_v45  ;;  %v1902_v7 = vrot.slane %v1825_v62, %v1901_v42  ;;  %v1826_v3 = vadd.f32 %v3331_v21, %v1801_v0 }
 0x56f   : > { %v1803_v11 = vpop.xlane.xlu1 %1802 }
 0x570   : > { %v1904_v5 = vsel %vm1903_vm8, %v1902_v7, %v1897_v2  ;;  %v1909_v10 = vrot.slane %v1826_v3, %v1908_v44  ;;  %v1827_v9 = vadd.f32 %v3331_v21, %v1803_v11 }
 0x571   : > { %v1805_v18 = vpop.xlane.xlu0 %1804 }
 0x572   : > { %v1911_v16 = vsel %vm1910_vm9, %v1909_v10, %v1904_v5  ;;  %v1916_v20 = vrot.slane %v1827_v9, %v1915_v4  ;;  %v1828_v22 = vadd.f32 %v3331_v21, %v1805_v18 }
 0x573   : > { %v1807_v24 = vpop.xlane.xlu1 %1806 }
 0x574   : > { %v1918_v26 = vsel %vm1917_vm10, %v1916_v20, %v1911_v16  ;;  %v1923_v14 = vrot.slane %v1828_v22, %v1922_v17  ;;  %v1829_v46 = vadd.f32 %v3331_v21, %v1807_v24 }
 0x575   : > { %v1809_v47 = vpop.xlane.xlu0 %1808 }
 0x576   : > { %v1925_v49 = vsel %vm1924_vm11, %v1923_v14, %v1918_v26  ;;  %v1930_v50 = vrot.slane %v1829_v46, %v1929_v23  ;;  %v1830_v51 = vadd.f32 %v3331_v21, %v1809_v47 }
 0x577   : > { %v1811_v53 = vpop.xlane.xlu1 %1810 }
 0x578   : > { %v1932_v54 = vsel %vm1931_vm12, %v1930_v50, %v1925_v49  ;;  %v1937_v27 = vrot.slane %v1830_v51, %v1936_v25  ;;  %v1831_v55 = vadd.f32 %v3331_v21, %v1811_v53 }
 0x579   : > { %v1813_v57 = vpop.xlane.xlu0 %1812 }
 0x57a   : > { %v1939_v28 = vsel %vm1938_vm13, %v1937_v27, %v1932_v54  ;;  %v1944_v29 = vrot.slane %v1831_v55, %v1943_v48  ;;  %v1832_v58 = vadd.f32 %v3331_v21, %v1813_v57 }
 0x57b   : > { %v1815_v13 = vpop.xlane.xlu1 %1814 }
 0x57c   : > { %v1946_v30 = vsel %vm1945_vm14, %v1944_v29, %v1939_v28  ;;  %v1951_v60 = vrot.slane %v1832_v58, %v1950_v56  ;;  %v1833_v31 = vadd.f32 %v3331_v21, %v1815_v13 }
 0x57e   : > { %v1953_v32 = vsel %vm1952_vm15, %v1951_v60, %v1946_v30  ;;  %v1958_v1 = vrot.slane %v1833_v31, %v1957_v59 }
 0x580   : > { %v1960_v12 = vsel %vm1959_vm0, %v1958_v1, %v1953_v32 }
 0x581   : > { %1962 = vst [vmem:[%s572_s20] sm:$0x1] %v1960_v12 }
 0x582   : > { %2797 = shalt.err (!%p2794_p13)
}
 0x583   : > { %s2798_s24 = scalar_lea.hbm %s3385_s27, 16  ;;  %s2802_s20 = scalar_lea.hbm %s3435_s15, 32 }
 0x584   : > { %p2799_p8 = scmp.ne.s32.totalorder %s3385_s27, %s2798_s24  ;;  %p2803_p2 = scmp.lt.s32.totalorder %s3385_s27, %s3435_s15 }
 0x585   : > { %p2804_p12 = scmp.lt.s32.totalorder %s2802_s20, %s2798_s24 }
 0x586   : > { %p2800_p11 = pnand %p2799_p8, %p3458_p6 }
 0x587   : > { %p2805_p10 = por %p2804_p12, %p2803_p2 }
 0x588   : > { %p2801_p0 = pneg %p2800_p11 }
 0x58a   : > { %p2806_p9 = pnand %p2805_p10, %p2801_p0 }
 0x58c   : > { %2809 = shalt.err (!%p2806_p9)
}
 0x58d   : > { %2611 = dma.vmem_to_hbm [thread:$0]  (%p3458_p6), %s1977_s30, 16, %s3385_s27, %s1964_s28  }
 0x58e PF: > { %s3459_s22 = sld [smem:[#allocation16_spill]]  ;;  %p2638_p5 = scmp.ge.s32.totalorder %s2856_s23, 2 }
 0x58f   : > { %s3460_s14 = sld [smem:[#allocation20_spill]] }
 0x594   : > { %s1988_s19 = sand.u32 1, %s3459_s22  }
 0x595   : > { %p3461_p1 = scmp.ne.s32.totalorder %s3460_s14, 0  ;;  %s1989_s17 = scalar_lea.sflag [#allocation5], %s1988_s19 }
 0x597   : > { %p2627_p3 = pnand %p2638_p5, %p3461_p1 }
 0x599   : > { %p2628_p4 = pneg %p2627_p3 }
 0x59b   : > { %2839 = dma.done.wait (%p2628_p4), %s1989_s17, 16  }
 0x59c   : > { %2841 = vsyncadd (%p2628_p4), %s1989_s17, 4294967280  ;;  %s3462_s23 = sld [smem:[#allocation18_spill]]  ;;  %s3465_s20 = smov %s2848_s21 }
 0x59d   : > { %s3463_s24 = sld [smem:[#allocation17_spill]] }
 0x59e   : > { %s3464_s22 = sld [smem:[#allocation19_spill]] }
 0x5a2   : > { %p29_p7 = scmp.ge.s32.totalorder %s3462_s23, 4  }
 0x5a3   : > { %s3466_s21 = smov %s3463_s24 }
 0x5a4   :  { %31 = sbr.rel (!%p29_p7) target bundleno = 8 (0x8), region = 138 }
 0x5a9   :  { %1993 = vsyncpa [#allocation4], 1 }
 0x5aa   :  { %1995 = vsyncpa [#allocation4 + $0x1], 1 }
 0x5ab   :  { %1996 = vsyncpa [#allocation7], 1 }
 0x5ac   :  { %1997 = vsyncpa [#allocation10], 1 }
 0x5ad   :  { %1998 = vsyncpa [#allocation5], 1 }
 0x5ae   :  { %2000 = vsyncpa [#allocation5 + $0x1], 1 }

</bundles_post_ra>
